<compile_context>
chip_gen: v6e
topology: v6e:2x2x1
jax: 0.10.0
libtpu: 0.0.40
codegen_flags: <defaults>
</compile_context>

<pallas_src>
import jax
import jax.numpy as jnp
from jax.experimental import pallas as pl
from jax.experimental.pallas import tpu as pltpu

EMB_DIM = 16
HIDDEN = 32
LABELS = 5
VOCAB = 50
SEQ = 8          # T
BATCH = 4        # B
NSEQ = 1 + LABELS            # main + 5 meta sequences
NB = NSEQ * BATCH            # 24 rows batched through the LSTM


# ----------------------------------------------------------- fused forward kernel
def _fused_kernel(ids_ref, tbl_ref, w_hh_ref, b_ref, msel_ref, out_ref):
    # ids_ref:  (T*NB, 1) int32   -- time-major: rows [t*NB, (t+1)*NB) are time t
    # tbl_ref:  (VOCAB, 4H) f32   -- embed @ W_ih, gate-reordered to [i, f, o, g]
    # w_hh_ref: (H, 4H) f32       -- gate-reordered to [i, f, o, g]
    # b_ref:    (1, 4H) f32       -- b_ih + b_hh folded, gate-reordered
    # msel_ref: (C, NB) f32       -- per-label averaging selector (1/(T*B) on meta rows)
    # out_ref:  (B, C) f32
    H = HIDDEN

    # ---- in-kernel embedding lookup fused with the input projection: one MXU op.
    # NOTE: out-of-range token ids (<0 or >= VOCAB) map to the zero row here, unlike
    # torch nn.Embedding gather semantics (which would error / read garbage).
    ids = ids_ref[...]                                                   # (T*NB, 1)
    vocab_iota = jax.lax.broadcasted_iota(jnp.int32, (SEQ * NB, VOCAB), 1)
    onehot = (ids == vocab_iota).astype(jnp.float32)                     # (T*NB, V)
    x_proj = jnp.dot(onehot, tbl_ref[...],
                     preferred_element_type=jnp.float32) + b_ref[...]    # (T*NB, 4H)

    w_hh = w_hh_ref[...]                                                 # (H, 4H)

    # full-vreg-width activation: one tanh pass, sigmoid via 0.5*(1 + tanh(x/2)).
    # Gate layout is [i, f, o, g] so lanes >= 3H are the tanh (g) gate.
    tanh_lane = jax.lax.broadcasted_iota(jnp.int32, (NB, 4 * H), 1) >= 3 * H

    def activate(gates):
        arg = jnp.where(tanh_lane, gates, gates * 0.5)
        t = jnp.tanh(arg)
        return jnp.where(tanh_lane, t, 0.5 * (t + 1.0))

    # ---- peeled first step (h_prev = c_prev = 0  =>  gates = x_proj[0:NB])
    act = activate(x_proj[0:NB, :])
    i = act[:, 0 * H:1 * H]
    o = act[:, 2 * H:3 * H]
    g = act[:, 3 * H:4 * H]
    c = i * g
    h = o * jnp.tanh(c)
    mx = h                                               # running max over time
    sm = h                                               # running sum over time

    # ---- remaining LSTM steps, fully unrolled, one MXU op per step
    for t in range(1, SEQ):
        gates = x_proj[t * NB:(t + 1) * NB, :] + jnp.dot(
            h, w_hh, preferred_element_type=jnp.float32)                 # (NB, 4H)
        act = activate(gates)
        i = act[:, 0 * H:1 * H]
        f = act[:, 1 * H:2 * H]
        o = act[:, 2 * H:3 * H]
        g = act[:, 3 * H:4 * H]
        c = f * c + i * g
        h = o * jnp.tanh(c)
        mx = jnp.maximum(mx, h)
        sm = sm + h

    # ---- pools + cosine logits
    x_main = mx[0:BATCH, :]                                              # (B, H) max over T
    proto_rows = jnp.dot(msel_ref[...], sm,
                         preferred_element_type=jnp.float32)             # (C, H) mean over T,B

    xn2 = jnp.sum(x_main * x_main, axis=1, keepdims=True)                # (B, 1)
    pn2 = jnp.sum(proto_rows * proto_rows, axis=1, keepdims=True)        # (C, 1)
    # NOTE: no epsilon, matching torch cos_vec (all-zero vectors would give inf/NaN there too)
    x_hat = x_main * jax.lax.rsqrt(xn2)
    p_hat = proto_rows * jax.lax.rsqrt(pn2)
    # cos(x, p) = <x/|x|, p/|p|>   (contract last dims: x_hat @ p_hat^T)
    out_ref[...] = jax.lax.dot_general(
        x_hat, p_hat, (((1,), (1,)), ((), ())),
        preferred_element_type=jnp.float32)                              # (B, C)


# ------------------------------------------------------------------- model glue
def init_params(key):
    ks = jax.random.split(key, 6)
    bound = 1.0 / jnp.sqrt(HIDDEN)
    params = {
        # nn.Embedding(len(vocab), emb_dim) -- vocab.vectors stand-in
        "embed": jax.random.normal(ks[0], (VOCAB, EMB_DIM), jnp.float32) * 0.1,
        # nn.LSTM weights, stored transposed as (in, 4H) / (H, 4H), torch gate order i,f,g,o
        "w_ih": jax.random.uniform(ks[1], (EMB_DIM, 4 * HIDDEN), jnp.float32, -bound, bound),
        "w_hh": jax.random.uniform(ks[2], (HIDDEN, 4 * HIDDEN), jnp.float32, -bound, bound),
        # b_ih + b_hh folded into one bias
        "bias": (jax.random.uniform(ks[3], (1, 4 * HIDDEN), jnp.float32, -bound, bound)
                 + jax.random.uniform(ks[4], (1, 4 * HIDDEN), jnp.float32, -bound, bound)),
        # out_bias exists in __init__ but is unused in forward
        "out_bias": jnp.zeros((LABELS,), jnp.float32),
    }
    return params


def _reorder_gates(m):
    """Reorder last-axis gate blocks from torch [i, f, g, o] to kernel [i, f, o, g]."""
    H = HIDDEN
    return jnp.concatenate(
        [m[..., 0:2 * H], m[..., 3 * H:4 * H], m[..., 2 * H:3 * H]], axis=-1)


def _meta_selector(T, B):
    """(C, NB) matrix: row c averages (1/(T*B)) the rows belonging to meta-seq c."""
    col = jnp.arange(NB)[None, :]                      # (1, NB)
    lab = jnp.arange(LABELS)[:, None]                  # (C, 1)
    in_group = (col >= B * (lab + 1)) & (col < B * (lab + 2))
    return in_group.astype(jnp.float32) / float(T * B)


def meta_classifier_forward(params, input_ids, meta_inputs):
    """input_ids: (T, B) int32; meta_inputs: list of 5 (T, B) int32 arrays."""
    assert len(meta_inputs) == 5
    T, B = input_ids.shape
    assert (T, B) == (SEQ, BATCH)
    for m in meta_inputs:
        assert m.shape == (SEQ, BATCH)  # TODO(synk): differing meta lengths unsupported

    # batch the 6 independent sequences along the batch axis: (T, NB)
    all_ids = jnp.concatenate([input_ids] + list(meta_inputs), axis=1)
    ids_flat = all_ids.reshape(T * NB, 1).astype(jnp.int32)   # time-major flatten

    # fold embedding + input projection into one (VOCAB, 4H) table; reorder gates.
    folded_tbl = _reorder_gates(
        jnp.dot(params["embed"], params["w_ih"], preferred_element_type=jnp.float32))
    w_hh = _reorder_gates(params["w_hh"])
    bias = _reorder_gates(params["bias"])
    msel = _meta_selector(T, B)

    cost = pl.CostEstimate(
        flops=4_000_000,          # onehot@tbl + 7x (h@W_hh) + gates/pools/cosine
        transcendentals=31_000,   # 8 x (full-width tanh + tanh(c))
        bytes_accessed=44_000,
    )

    vmem = pl.BlockSpec(memory_space=pltpu.MemorySpace.VMEM)
    return pl.pallas_call(
        _fused_kernel,
        out_shape=jax.ShapeDtypeStruct((B, LABELS), jnp.float32),
        in_specs=[vmem] * 5,
        out_specs=vmem,
        cost_estimate=cost,
    )(ids_flat, folded_tbl, w_hh, bias, msel)


# --------------------------------------------------------------- pure-JAX check
def _lstm_ref(x_emb, w_ih, w_hh, bias):
    B, H = x_emb.shape[1], w_hh.shape[0]

    def step(carry, x_t):
        h, c = carry
        gates = x_t @ w_ih + h @ w_hh + bias[0]
        i = jax.nn.sigmoid(gates[:, :H])
        f = jax.nn.sigmoid(gates[:, H:2 * H])
        g = jnp.tanh(gates[:, 2 * H:3 * H])
        o = jax.nn.sigmoid(gates[:, 3 * H:])
        c = f * c + i * g
        h = o * jnp.tanh(c)
        return (h, c), h

    init = (jnp.zeros((B, H), jnp.float32), jnp.zeros((B, H), jnp.float32))
    _, ys = jax.lax.scan(step, init, x_emb)
    return ys


def _forward_ref(params, input_ids, meta_inputs):
    def gv(ids):
        return _lstm_ref(params["embed"][ids], params["w_ih"], params["w_hh"], params["bias"])

    ov = gv(input_ids)
    metas = [jnp.mean(jnp.mean(gv(ids), axis=0), axis=0) for ids in meta_inputs]
    proto = jnp.stack(metas, axis=1)
    x = jnp.max(ov, axis=0)
    dots = x @ proto
    xn = jnp.linalg.norm(x, axis=1, keepdims=True)
    pn = jnp.linalg.norm(proto, axis=0, keepdims=True)
    return dots / (xn * pn)


if __name__ == "__main__":
    key = jax.random.PRNGKey(0)
    pkey, ikey = jax.random.split(key)
    params = init_params(pkey)

    ikeys = jax.random.split(ikey, 6)
    input_ids = jax.random.randint(ikeys[0], (SEQ, BATCH), 0, VOCAB, dtype=jnp.int32)
    meta_inputs = [
        jax.random.randint(ikeys[k + 1], (SEQ, BATCH), 0, VOCAB, dtype=jnp.int32)
        for k in range(5)
    ]

    logits = meta_classifier_forward(params, input_ids, meta_inputs)
    logits = jax.block_until_ready(logits)

    ref = jax.block_until_ready(_forward_ref(params, input_ids, meta_inputs))
    assert logits.shape == (BATCH, LABELS)
    assert jnp.max(jnp.abs(logits - ref)) < 5e-3, "mismatch vs pure-JAX reference"

    print("KERNEL_OK")
</pallas_src>

<mosaic_0001>
module attributes {stable_mosaic.version = 11 : i64} {
  func.func @_fused_kernel(%arg0: memref<192x1xi32, #tpu.memory_space<vmem>>, %arg1: memref<50x128xf32, #tpu.memory_space<vmem>>, %arg2: memref<32x128xf32, #tpu.memory_space<vmem>>, %arg3: memref<1x128xf32, #tpu.memory_space<vmem>>, %arg4: memref<5x24xf32, #tpu.memory_space<vmem>>, %arg5: memref<4x5xf32, #tpu.memory_space<vmem>>) attributes {dimension_semantics = [], scalar_prefetch = 0 : i64, scratch_operands = 0 : i64, tpu.core_type = #tpu.core_type<tc>} {
    %c0 = arith.constant 0 : index
    %c0_0 = arith.constant 0 : index
    %0 = vector.load %arg0[%c0, %c0_0] : memref<192x1xi32, #tpu.memory_space<vmem>>, vector<192x1xi32>
    %1 = tpu.iota {dimensions = array<i32: 1>} : vector<192x50xi32>
    %2 = vector.broadcast %0 : vector<192x1xi32> to vector<192x50xi32>
    %3 = arith.cmpi eq, %2, %1 : vector<192x50xi32>
    %4 = arith.extui %3 : vector<192x50xi1> to vector<192x50xi32>
    %5 = arith.sitofp %4 : vector<192x50xi32> to vector<192x50xf32>
    %c0_1 = arith.constant 0 : index
    %c0_2 = arith.constant 0 : index
    %6 = vector.load %arg1[%c0_1, %c0_2] : memref<50x128xf32, #tpu.memory_space<vmem>>, vector<50x128xf32>
    %cst = arith.constant dense<0.000000e+00> : vector<192x128xf32>
    %7 = tpu.matmul %5, %6, %cst {dimension_numbers = #tpu.dot_dimension_numbers<[1], [0], [0], [1], [0, 0, 1, 1], [], []>} : vector<192x50xf32>, vector<50x128xf32>, vector<192x128xf32> -> vector<192x128xf32>
    %c0_3 = arith.constant 0 : index
    %c0_4 = arith.constant 0 : index
    %8 = vector.load %arg3[%c0_3, %c0_4] : memref<1x128xf32, #tpu.memory_space<vmem>>, vector<1x128xf32>
    %9 = vector.broadcast %8 : vector<1x128xf32> to vector<192x128xf32>
    %10 = arith.addf %7, %9 : vector<192x128xf32>
    %c0_5 = arith.constant 0 : index
    %c0_6 = arith.constant 0 : index
    %11 = vector.load %arg2[%c0_5, %c0_6] : memref<32x128xf32, #tpu.memory_space<vmem>>, vector<32x128xf32>
    %12 = tpu.iota {dimensions = array<i32: 1>} : vector<24x128xi32>
    %c96_i32 = arith.constant 96 : i32
    %13 = vector.broadcast %c96_i32 : i32 to vector<24x128xi32>
    %14 = arith.cmpi sge, %12, %13 : vector<24x128xi32>
    %15 = vector.extract_strided_slice %10 {offsets = [0, 0], sizes = [24, 128], strides = [1, 1]} : vector<192x128xf32> to vector<24x128xf32>
    %cst_7 = arith.constant 5.000000e-01 : f32
    %16 = vector.broadcast %cst_7 : f32 to vector<24x128xf32>
    %17 = arith.mulf %15, %16 : vector<24x128xf32>
    %18 = arith.select %14, %15, %17 : vector<24x128xi1>, vector<24x128xf32>
    %19 = math.tanh %18 : vector<24x128xf32>
    %cst_8 = arith.constant 1.000000e+00 : f32
    %20 = vector.broadcast %cst_8 : f32 to vector<24x128xf32>
    %21 = arith.addf %19, %20 : vector<24x128xf32>
    %cst_9 = arith.constant 5.000000e-01 : f32
    %22 = vector.broadcast %cst_9 : f32 to vector<24x128xf32>
    %23 = arith.mulf %22, %21 : vector<24x128xf32>
    %24 = arith.select %14, %19, %23 : vector<24x128xi1>, vector<24x128xf32>
    %25 = vector.extract_strided_slice %24 {offsets = [0, 0], sizes = [24, 32], strides = [1, 1]} : vector<24x128xf32> to vector<24x32xf32>
    %26 = vector.extract_strided_slice %24 {offsets = [0, 64], sizes = [24, 32], strides = [1, 1]} : vector<24x128xf32> to vector<24x32xf32>
    %27 = vector.extract_strided_slice %24 {offsets = [0, 96], sizes = [24, 32], strides = [1, 1]} : vector<24x128xf32> to vector<24x32xf32>
    %28 = arith.mulf %25, %27 : vector<24x32xf32>
    %29 = math.tanh %28 : vector<24x32xf32>
    %30 = arith.mulf %26, %29 : vector<24x32xf32>
    %31 = vector.extract_strided_slice %10 {offsets = [24, 0], sizes = [24, 128], strides = [1, 1]} : vector<192x128xf32> to vector<24x128xf32>
    %cst_10 = arith.constant dense<0.000000e+00> : vector<24x128xf32>
    %32 = tpu.matmul %30, %11, %cst_10 {dimension_numbers = #tpu.dot_dimension_numbers<[1], [0], [0], [1], [0, 0, 1, 1], [], []>} : vector<24x32xf32>, vector<32x128xf32>, vector<24x128xf32> -> vector<24x128xf32>
    %33 = arith.addf %31, %32 : vector<24x128xf32>
    %cst_11 = arith.constant 5.000000e-01 : f32
    %34 = vector.broadcast %cst_11 : f32 to vector<24x128xf32>
    %35 = arith.mulf %33, %34 : vector<24x128xf32>
    %36 = arith.select %14, %33, %35 : vector<24x128xi1>, vector<24x128xf32>
    %37 = math.tanh %36 : vector<24x128xf32>
    %cst_12 = arith.constant 1.000000e+00 : f32
    %38 = vector.broadcast %cst_12 : f32 to vector<24x128xf32>
    %39 = arith.addf %37, %38 : vector<24x128xf32>
    %cst_13 = arith.constant 5.000000e-01 : f32
    %40 = vector.broadcast %cst_13 : f32 to vector<24x128xf32>
    %41 = arith.mulf %40, %39 : vector<24x128xf32>
    %42 = arith.select %14, %37, %41 : vector<24x128xi1>, vector<24x128xf32>
    %43 = vector.extract_strided_slice %42 {offsets = [0, 0], sizes = [24, 32], strides = [1, 1]} : vector<24x128xf32> to vector<24x32xf32>
    %44 = vector.extract_strided_slice %42 {offsets = [0, 32], sizes = [24, 32], strides = [1, 1]} : vector<24x128xf32> to vector<24x32xf32>
    %45 = vector.extract_strided_slice %42 {offsets = [0, 64], sizes = [24, 32], strides = [1, 1]} : vector<24x128xf32> to vector<24x32xf32>
    %46 = vector.extract_strided_slice %42 {offsets = [0, 96], sizes = [24, 32], strides = [1, 1]} : vector<24x128xf32> to vector<24x32xf32>
    %47 = arith.mulf %44, %28 : vector<24x32xf32>
    %48 = arith.mulf %43, %46 : vector<24x32xf32>
    %49 = arith.addf %47, %48 : vector<24x32xf32>
    %50 = math.tanh %49 : vector<24x32xf32>
    %51 = arith.mulf %45, %50 : vector<24x32xf32>
    %52 = arith.maximumf %30, %51 : vector<24x32xf32>
    %53 = arith.addf %30, %51 : vector<24x32xf32>
    %54 = vector.extract_strided_slice %10 {offsets = [48, 0], sizes = [24, 128], strides = [1, 1]} : vector<192x128xf32> to vector<24x128xf32>
    %cst_14 = arith.constant dense<0.000000e+00> : vector<24x128xf32>
    %55 = tpu.matmul %51, %11, %cst_14 {dimension_numbers = #tpu.dot_dimension_numbers<[1], [0], [0], [1], [0, 0, 1, 1], [], []>} : vector<24x32xf32>, vector<32x128xf32>, vector<24x128xf32> -> vector<24x128xf32>
    %56 = arith.addf %54, %55 : vector<24x128xf32>
    %cst_15 = arith.constant 5.000000e-01 : f32
    %57 = vector.broadcast %cst_15 : f32 to vector<24x128xf32>
    %58 = arith.mulf %56, %57 : vector<24x128xf32>
    %59 = arith.select %14, %56, %58 : vector<24x128xi1>, vector<24x128xf32>
    %60 = math.tanh %59 : vector<24x128xf32>
    %cst_16 = arith.constant 1.000000e+00 : f32
    %61 = vector.broadcast %cst_16 : f32 to vector<24x128xf32>
    %62 = arith.addf %60, %61 : vector<24x128xf32>
    %cst_17 = arith.constant 5.000000e-01 : f32
    %63 = vector.broadcast %cst_17 : f32 to vector<24x128xf32>
    %64 = arith.mulf %63, %62 : vector<24x128xf32>
    %65 = arith.select %14, %60, %64 : vector<24x128xi1>, vector<24x128xf32>
    %66 = vector.extract_strided_slice %65 {offsets = [0, 0], sizes = [24, 32], strides = [1, 1]} : vector<24x128xf32> to vector<24x32xf32>
    %67 = vector.extract_strided_slice %65 {offsets = [0, 32], sizes = [24, 32], strides = [1, 1]} : vector<24x128xf32> to vector<24x32xf32>
    %68 = vector.extract_strided_slice %65 {offsets = [0, 64], sizes = [24, 32], strides = [1, 1]} : vector<24x128xf32> to vector<24x32xf32>
    %69 = vector.extract_strided_slice %65 {offsets = [0, 96], sizes = [24, 32], strides = [1, 1]} : vector<24x128xf32> to vector<24x32xf32>
    %70 = arith.mulf %67, %49 : vector<24x32xf32>
    %71 = arith.mulf %66, %69 : vector<24x32xf32>
    %72 = arith.addf %70, %71 : vector<24x32xf32>
    %73 = math.tanh %72 : vector<24x32xf32>
    %74 = arith.mulf %68, %73 : vector<24x32xf32>
    %75 = arith.maximumf %52, %74 : vector<24x32xf32>
    %76 = arith.addf %53, %74 : vector<24x32xf32>
    %77 = vector.extract_strided_slice %10 {offsets = [72, 0], sizes = [24, 128], strides = [1, 1]} : vector<192x128xf32> to vector<24x128xf32>
    %cst_18 = arith.constant dense<0.000000e+00> : vector<24x128xf32>
    %78 = tpu.matmul %74, %11, %cst_18 {dimension_numbers = #tpu.dot_dimension_numbers<[1], [0], [0], [1], [0, 0, 1, 1], [], []>} : vector<24x32xf32>, vector<32x128xf32>, vector<24x128xf32> -> vector<24x128xf32>
    %79 = arith.addf %77, %78 : vector<24x128xf32>
    %cst_19 = arith.constant 5.000000e-01 : f32
    %80 = vector.broadcast %cst_19 : f32 to vector<24x128xf32>
    %81 = arith.mulf %79, %80 : vector<24x128xf32>
    %82 = arith.select %14, %79, %81 : vector<24x128xi1>, vector<24x128xf32>
    %83 = math.tanh %82 : vector<24x128xf32>
    %cst_20 = arith.constant 1.000000e+00 : f32
    %84 = vector.broadcast %cst_20 : f32 to vector<24x128xf32>
    %85 = arith.addf %83, %84 : vector<24x128xf32>
    %cst_21 = arith.constant 5.000000e-01 : f32
    %86 = vector.broadcast %cst_21 : f32 to vector<24x128xf32>
    %87 = arith.mulf %86, %85 : vector<24x128xf32>
    %88 = arith.select %14, %83, %87 : vector<24x128xi1>, vector<24x128xf32>
    %89 = vector.extract_strided_slice %88 {offsets = [0, 0], sizes = [24, 32], strides = [1, 1]} : vector<24x128xf32> to vector<24x32xf32>
    %90 = vector.extract_strided_slice %88 {offsets = [0, 32], sizes = [24, 32], strides = [1, 1]} : vector<24x128xf32> to vector<24x32xf32>
    %91 = vector.extract_strided_slice %88 {offsets = [0, 64], sizes = [24, 32], strides = [1, 1]} : vector<24x128xf32> to vector<24x32xf32>
    %92 = vector.extract_strided_slice %88 {offsets = [0, 96], sizes = [24, 32], strides = [1, 1]} : vector<24x128xf32> to vector<24x32xf32>
    %93 = arith.mulf %90, %72 : vector<24x32xf32>
    %94 = arith.mulf %89, %92 : vector<24x32xf32>
    %95 = arith.addf %93, %94 : vector<24x32xf32>
    %96 = math.tanh %95 : vector<24x32xf32>
    %97 = arith.mulf %91, %96 : vector<24x32xf32>
    %98 = arith.maximumf %75, %97 : vector<24x32xf32>
    %99 = arith.addf %76, %97 : vector<24x32xf32>
    %100 = vector.extract_strided_slice %10 {offsets = [96, 0], sizes = [24, 128], strides = [1, 1]} : vector<192x128xf32> to vector<24x128xf32>
    %cst_22 = arith.constant dense<0.000000e+00> : vector<24x128xf32>
    %101 = tpu.matmul %97, %11, %cst_22 {dimension_numbers = #tpu.dot_dimension_numbers<[1], [0], [0], [1], [0, 0, 1, 1], [], []>} : vector<24x32xf32>, vector<32x128xf32>, vector<24x128xf32> -> vector<24x128xf32>
    %102 = arith.addf %100, %101 : vector<24x128xf32>
    %cst_23 = arith.constant 5.000000e-01 : f32
    %103 = vector.broadcast %cst_23 : f32 to vector<24x128xf32>
    %104 = arith.mulf %102, %103 : vector<24x128xf32>
    %105 = arith.select %14, %102, %104 : vector<24x128xi1>, vector<24x128xf32>
    %106 = math.tanh %105 : vector<24x128xf32>
    %cst_24 = arith.constant 1.000000e+00 : f32
    %107 = vector.broadcast %cst_24 : f32 to vector<24x128xf32>
    %108 = arith.addf %106, %107 : vector<24x128xf32>
    %cst_25 = arith.constant 5.000000e-01 : f32
    %109 = vector.broadcast %cst_25 : f32 to vector<24x128xf32>
    %110 = arith.mulf %109, %108 : vector<24x128xf32>
    %111 = arith.select %14, %106, %110 : vector<24x128xi1>, vector<24x128xf32>
    %112 = vector.extract_strided_slice %111 {offsets = [0, 0], sizes = [24, 32], strides = [1, 1]} : vector<24x128xf32> to vector<24x32xf32>
    %113 = vector.extract_strided_slice %111 {offsets = [0, 32], sizes = [24, 32], strides = [1, 1]} : vector<24x128xf32> to vector<24x32xf32>
    %114 = vector.extract_strided_slice %111 {offsets = [0, 64], sizes = [24, 32], strides = [1, 1]} : vector<24x128xf32> to vector<24x32xf32>
    %115 = vector.extract_strided_slice %111 {offsets = [0, 96], sizes = [24, 32], strides = [1, 1]} : vector<24x128xf32> to vector<24x32xf32>
    %116 = arith.mulf %113, %95 : vector<24x32xf32>
    %117 = arith.mulf %112, %115 : vector<24x32xf32>
    %118 = arith.addf %116, %117 : vector<24x32xf32>
    %119 = math.tanh %118 : vector<24x32xf32>
    %120 = arith.mulf %114, %119 : vector<24x32xf32>
    %121 = arith.maximumf %98, %120 : vector<24x32xf32>
    %122 = arith.addf %99, %120 : vector<24x32xf32>
    %123 = vector.extract_strided_slice %10 {offsets = [120, 0], sizes = [24, 128], strides = [1, 1]} : vector<192x128xf32> to vector<24x128xf32>
    %cst_26 = arith.constant dense<0.000000e+00> : vector<24x128xf32>
    %124 = tpu.matmul %120, %11, %cst_26 {dimension_numbers = #tpu.dot_dimension_numbers<[1], [0], [0], [1], [0, 0, 1, 1], [], []>} : vector<24x32xf32>, vector<32x128xf32>, vector<24x128xf32> -> vector<24x128xf32>
    %125 = arith.addf %123, %124 : vector<24x128xf32>
    %cst_27 = arith.constant 5.000000e-01 : f32
    %126 = vector.broadcast %cst_27 : f32 to vector<24x128xf32>
    %127 = arith.mulf %125, %126 : vector<24x128xf32>
    %128 = arith.select %14, %125, %127 : vector<24x128xi1>, vector<24x128xf32>
    %129 = math.tanh %128 : vector<24x128xf32>
    %cst_28 = arith.constant 1.000000e+00 : f32
    %130 = vector.broadcast %cst_28 : f32 to vector<24x128xf32>
    %131 = arith.addf %129, %130 : vector<24x128xf32>
    %cst_29 = arith.constant 5.000000e-01 : f32
    %132 = vector.broadcast %cst_29 : f32 to vector<24x128xf32>
    %133 = arith.mulf %132, %131 : vector<24x128xf32>
    %134 = arith.select %14, %129, %133 : vector<24x128xi1>, vector<24x128xf32>
    %135 = vector.extract_strided_slice %134 {offsets = [0, 0], sizes = [24, 32], strides = [1, 1]} : vector<24x128xf32> to vector<24x32xf32>
    %136 = vector.extract_strided_slice %134 {offsets = [0, 32], sizes = [24, 32], strides = [1, 1]} : vector<24x128xf32> to vector<24x32xf32>
    %137 = vector.extract_strided_slice %134 {offsets = [0, 64], sizes = [24, 32], strides = [1, 1]} : vector<24x128xf32> to vector<24x32xf32>
    %138 = vector.extract_strided_slice %134 {offsets = [0, 96], sizes = [24, 32], strides = [1, 1]} : vector<24x128xf32> to vector<24x32xf32>
    %139 = arith.mulf %136, %118 : vector<24x32xf32>
    %140 = arith.mulf %135, %138 : vector<24x32xf32>
    %141 = arith.addf %139, %140 : vector<24x32xf32>
    %142 = math.tanh %141 : vector<24x32xf32>
    %143 = arith.mulf %137, %142 : vector<24x32xf32>
    %144 = arith.maximumf %121, %143 : vector<24x32xf32>
    %145 = arith.addf %122, %143 : vector<24x32xf32>
    %146 = vector.extract_strided_slice %10 {offsets = [144, 0], sizes = [24, 128], strides = [1, 1]} : vector<192x128xf32> to vector<24x128xf32>
    %cst_30 = arith.constant dense<0.000000e+00> : vector<24x128xf32>
    %147 = tpu.matmul %143, %11, %cst_30 {dimension_numbers = #tpu.dot_dimension_numbers<[1], [0], [0], [1], [0, 0, 1, 1], [], []>} : vector<24x32xf32>, vector<32x128xf32>, vector<24x128xf32> -> vector<24x128xf32>
    %148 = arith.addf %146, %147 : vector<24x128xf32>
    %cst_31 = arith.constant 5.000000e-01 : f32
    %149 = vector.broadcast %cst_31 : f32 to vector<24x128xf32>
    %150 = arith.mulf %148, %149 : vector<24x128xf32>
    %151 = arith.select %14, %148, %150 : vector<24x128xi1>, vector<24x128xf32>
    %152 = math.tanh %151 : vector<24x128xf32>
    %cst_32 = arith.constant 1.000000e+00 : f32
    %153 = vector.broadcast %cst_32 : f32 to vector<24x128xf32>
    %154 = arith.addf %152, %153 : vector<24x128xf32>
    %cst_33 = arith.constant 5.000000e-01 : f32
    %155 = vector.broadcast %cst_33 : f32 to vector<24x128xf32>
    %156 = arith.mulf %155, %154 : vector<24x128xf32>
    %157 = arith.select %14, %152, %156 : vector<24x128xi1>, vector<24x128xf32>
    %158 = vector.extract_strided_slice %157 {offsets = [0, 0], sizes = [24, 32], strides = [1, 1]} : vector<24x128xf32> to vector<24x32xf32>
    %159 = vector.extract_strided_slice %157 {offsets = [0, 32], sizes = [24, 32], strides = [1, 1]} : vector<24x128xf32> to vector<24x32xf32>
    %160 = vector.extract_strided_slice %157 {offsets = [0, 64], sizes = [24, 32], strides = [1, 1]} : vector<24x128xf32> to vector<24x32xf32>
    %161 = vector.extract_strided_slice %157 {offsets = [0, 96], sizes = [24, 32], strides = [1, 1]} : vector<24x128xf32> to vector<24x32xf32>
    %162 = arith.mulf %159, %141 : vector<24x32xf32>
    %163 = arith.mulf %158, %161 : vector<24x32xf32>
    %164 = arith.addf %162, %163 : vector<24x32xf32>
    %165 = math.tanh %164 : vector<24x32xf32>
    %166 = arith.mulf %160, %165 : vector<24x32xf32>
    %167 = arith.maximumf %144, %166 : vector<24x32xf32>
    %168 = arith.addf %145, %166 : vector<24x32xf32>
    %169 = vector.extract_strided_slice %10 {offsets = [168, 0], sizes = [24, 128], strides = [1, 1]} : vector<192x128xf32> to vector<24x128xf32>
    %cst_34 = arith.constant dense<0.000000e+00> : vector<24x128xf32>
    %170 = tpu.matmul %166, %11, %cst_34 {dimension_numbers = #tpu.dot_dimension_numbers<[1], [0], [0], [1], [0, 0, 1, 1], [], []>} : vector<24x32xf32>, vector<32x128xf32>, vector<24x128xf32> -> vector<24x128xf32>
    %171 = arith.addf %169, %170 : vector<24x128xf32>
    %cst_35 = arith.constant 5.000000e-01 : f32
    %172 = vector.broadcast %cst_35 : f32 to vector<24x128xf32>
    %173 = arith.mulf %171, %172 : vector<24x128xf32>
    %174 = arith.select %14, %171, %173 : vector<24x128xi1>, vector<24x128xf32>
    %175 = math.tanh %174 : vector<24x128xf32>
    %cst_36 = arith.constant 1.000000e+00 : f32
    %176 = vector.broadcast %cst_36 : f32 to vector<24x128xf32>
    %177 = arith.addf %175, %176 : vector<24x128xf32>
    %cst_37 = arith.constant 5.000000e-01 : f32
    %178 = vector.broadcast %cst_37 : f32 to vector<24x128xf32>
    %179 = arith.mulf %178, %177 : vector<24x128xf32>
    %180 = arith.select %14, %175, %179 : vector<24x128xi1>, vector<24x128xf32>
    %181 = vector.extract_strided_slice %180 {offsets = [0, 0], sizes = [24, 32], strides = [1, 1]} : vector<24x128xf32> to vector<24x32xf32>
    %182 = vector.extract_strided_slice %180 {offsets = [0, 32], sizes = [24, 32], strides = [1, 1]} : vector<24x128xf32> to vector<24x32xf32>
    %183 = vector.extract_strided_slice %180 {offsets = [0, 64], sizes = [24, 32], strides = [1, 1]} : vector<24x128xf32> to vector<24x32xf32>
    %184 = vector.extract_strided_slice %180 {offsets = [0, 96], sizes = [24, 32], strides = [1, 1]} : vector<24x128xf32> to vector<24x32xf32>
    %185 = arith.mulf %182, %164 : vector<24x32xf32>
    %186 = arith.mulf %181, %184 : vector<24x32xf32>
    %187 = arith.addf %185, %186 : vector<24x32xf32>
    %188 = math.tanh %187 : vector<24x32xf32>
    %189 = arith.mulf %183, %188 : vector<24x32xf32>
    %190 = arith.maximumf %167, %189 : vector<24x32xf32>
    %191 = arith.addf %168, %189 : vector<24x32xf32>
    %192 = vector.extract_strided_slice %190 {offsets = [0, 0], sizes = [4, 32], strides = [1, 1]} : vector<24x32xf32> to vector<4x32xf32>
    %c0_38 = arith.constant 0 : index
    %c0_39 = arith.constant 0 : index
    %193 = vector.load %arg4[%c0_38, %c0_39] : memref<5x24xf32, #tpu.memory_space<vmem>>, vector<5x24xf32>
    %cst_40 = arith.constant dense<0.000000e+00> : vector<5x32xf32>
    %194 = tpu.matmul %193, %191, %cst_40 {dimension_numbers = #tpu.dot_dimension_numbers<[1], [0], [0], [1], [0, 0, 1, 1], [], []>} : vector<5x24xf32>, vector<24x32xf32>, vector<5x32xf32> -> vector<5x32xf32>
    %195 = arith.mulf %192, %192 : vector<4x32xf32>
    %cst_41 = arith.constant dense<0.000000e+00> : vector<4xf32>
    %196 = vector.multi_reduction <add>, %195, %cst_41 [1] : vector<4x32xf32> to vector<4xf32>
    %197 = vector.shape_cast %196 : vector<4xf32> to vector<4x1xf32>
    %198 = arith.mulf %194, %194 : vector<5x32xf32>
    %cst_42 = arith.constant dense<0.000000e+00> : vector<5xf32>
    %199 = vector.multi_reduction <add>, %198, %cst_42 [1] : vector<5x32xf32> to vector<5xf32>
    %200 = vector.shape_cast %199 : vector<5xf32> to vector<5x1xf32>
    %201 = math.rsqrt %197 : vector<4x1xf32>
    %202 = vector.broadcast %201 : vector<4x1xf32> to vector<4x32xf32>
    %203 = arith.mulf %192, %202 : vector<4x32xf32>
    %204 = math.rsqrt %200 : vector<5x1xf32>
    %205 = vector.broadcast %204 : vector<5x1xf32> to vector<5x32xf32>
    %206 = arith.mulf %194, %205 : vector<5x32xf32>
    %cst_43 = arith.constant dense<0.000000e+00> : vector<4x5xf32>
    %207 = tpu.matmul %203, %206, %cst_43 {dimension_numbers = #tpu.dot_dimension_numbers<[1], [1], [0], [0], [0, 0, 1, 0], [], []>} : vector<4x32xf32>, vector<5x32xf32>, vector<4x5xf32> -> vector<4x5xf32>
    %c0_44 = arith.constant 0 : index
    %c0_45 = arith.constant 0 : index
    %208 = vector.load %arg5[%c0_44, %c0_45] : memref<4x5xf32, #tpu.memory_space<vmem>>, vector<4x5xf32>
    tpu.vector_store %arg5[%c0_44, %c0_45], %207 {strides = array<i32>} : memref<4x5xf32, #tpu.memory_space<vmem>>, vector<4x5xf32>,
    return
  }
}

</mosaic_0001>

<bundles_post_ra>
// kernel: tpu_custom_call.1
= control target key start
LH: loop header
LB: loop body
LE: loop exit
PB: predicated region body
PF: predicated region fallthrough
CT: control target
= control target key end

     0   :  { %vm278_vm0 = vcmask 1041408   ;;  %v2406_v2 = vmov 0   ;;  %v2407_v7 = vmov 0.0   ;;  %s3191_s0 = inlined_call_operand.vmem [shape: s32[192,1], index: 0, kind: input, shape index: {}]   ;;  %s3192_s1 = inlined_call_operand.vmem [shape: f32[50,128], index: 1, kind: input, shape index: {}]   ;;  %s3193_s2 = inlined_call_operand.vmem [shape: f32[32,128], index: 2, kind: input, shape index: {}]   ;;  %s3194_s3 = inlined_call_operand.vmem [shape: f32[1,128], index: 3, kind: input, shape index: {}]   ;;  %s3195_s4 = inlined_call_operand.vmem [shape: f32[5,24], index: 4, kind: input, shape index: {}]   ;;  %s3196_s5 = inlined_call_operand.hbm [shape: f32[4,5], index: 5, kind: output, shape index: {}]  }
   0x1   :  { %v21_v0 = vld [vmem:[%s3191_s0] sm:$0xff]  ;;  %v23_v1 = vld [vmem:[%s3191_s0 + $0x10] sm:$0xff]  ;;  %2281 = vset.pattern.permute.xlu0 %v2406_v2  ;;  %2282 = vset.pattern.permute.xlu1 %v2406_v2  ;;  %v196_v4 = vld [vmem:[%s3192_s1 + $0x28] sm:$0xff] }
   0x2   :  { %v197_v3 = vld [vmem:[%s3192_s1 + $0x30] sm:$0x3]  ;;  %48 = vperm.xlu0 %2281, %v21_v0   ;;  %54 = vperm.xlu1 %2282, %v23_v1   ;;  %v22_v5 = vld [vmem:[%s3191_s0 + $0x8] sm:$0xff]  ;;  %v24_v6 = vld [vmem:[%s3191_s0 + $0x18] sm:$0xff] }
   0x3   :  { %2092 = vmatprep.subr.msk.mxu0 %vm278_vm0, %v197_v3  ;;  %2142 = vmatprep.subr.mxu1 %v2407_v7 }
   0x4   :  { %10 = vsyncpa [#allocation3], 0  ;;  %2093 = vmatpush3.msk.msra.mxu0 %vm278_vm0, %v197_v3  ;;  %v195_v8 = vld [vmem:[%s3192_s1 + $0x20] sm:$0xff]  ;;  %v194_v9 = vld [vmem:[%s3192_s1 + $0x18] sm:$0xff]  ;;  %v45_v13 = vlaneseq  ;;  %vm205_vm1 = vcmask 408576   ;;  %s2408_s16 = smov 32  }
   0x5   :  { %2094 = vmatprep.subr.mxu0 %v196_v4  ;;  %v193_v10 = vld [vmem:[%s3192_s1 + $0x10] sm:$0xff]  ;;  %v192_v11 = vld [vmem:[%s3192_s1 + $0x8] sm:$0xff]  ;;  %v191_v12 = vld [vmem:[%s3192_s1] sm:$0xff]  ;;  %s2409_s17 = smov 64   ;;  %vm2410_vm7 = vmmov 0   ;;  %vm532_vm10 = vcmask 261120  }
   0x6   :  { %51 = vperm.xlu0 %2281, %v22_v5   ;;  %57 = vperm.xlu1 %2282, %v24_v6   ;;  %v2477_v14 = vand.u32 127, %v45_v13  ;;  %v2494_v23 = vld [vmem:[%s3194_s3] ss:$0 sm:$0xff]  ;;  %v26_v59 = vld [vmem:[%s3191_s0 + $0x28] sm:$0xff]  ;;  %v2538_v60 = vld [vmem:[%s3193_s2 + $0x18] sm:$0xff] }
   0x7   :  { %2095 = vmatpush3.msra.mxu0 %v196_v4  ;;  %v25_v57 = vld [vmem:[%s3191_s0 + $0x20] sm:$0xff]  ;;  %v2543_v61 = vld [vmem:[%s3193_s2 + $0x10] sm:$0xff]  ;;  %2143 = vmatpush3.msra.mxu1 %v2538_v60  ;;  %v2551_v62 = vld [vmem:[%s3193_s2 + $0x8] sm:$0xff] }
   0x8   :  { %2096 = vmatprep.subr.mxu0 %v195_v8  ;;  %vm471_vm6 = vcmp.ge.s32.totalorder %v2477_v14, 96  ;;  %2144 = vmatprep.subr.mxu1 %v2407_v7  ;;  %v2565_v63 = vld [vmem:[%s3193_s2] sm:$0xff] }
   0x9   :  { %2097 = vmatpush3.msra.mxu0 %v195_v8  ;;  %2145 = vmatpush3.msra.mxu1 %v2543_v61 }
   0xa   :  { %2098 = vmatprep.subr.mxu0 %v194_v9  ;;  %2146 = vmatprep.subr.mxu1 %v2407_v7 }
   0xb   :  { %2099 = vmatpush3.msra.mxu0 %v194_v9  ;;  %2147 = vmatpush3.msra.mxu1 %v2551_v62 }
   0xc   :  { %2100 = vmatprep.subr.mxu0 %v193_v10  ;;  %2148 = vmatprep.subr.mxu1 %v2407_v7 }
   0xd   :  { %2101 = vmatpush3.msra.mxu0 %v193_v10  ;;  %2149 = vmatpush3.msra.mxu1 %v2565_v63 }
   0xe   :  { %2102 = vmatprep.subr.mxu0 %v192_v11  ;;  %2150 = vmatprep.mubr.msk.f32.mxu1 %vm2410_vm7, %v2407_v7 }
   0xf   :  { %2103 = vmatpush3.msra.mxu0 %v192_v11  ;;  %2159 = vmatprep.subr.mxu1 %v2407_v7 }
  0x10   :  { %2104 = vmatprep.subr.mxu0 %v191_v12 }
  0x11   :  { %2105 = vmatpush3.msra.mxu0 %v191_v12 }
  0x12   :  { %2227 = vmatprep.subr.mxu0 %v2407_v7 }
  0x7d   :  { %v49_v15 = vpop.permute.xlu0 %48  ;;  %v55_v16 = vpop.permute.xlu1 %54 }
  0x7e   :  { %vm119_vm2 = vcmp.eq.s32.totalorder %v49_v15, %v2477_v14  ;;  %vm121_vm3 = vcmp.eq.s32.totalorder %v55_v16, %v2477_v14 }
  0x7f   :  { %v1932_v17 = vsel %vm119_vm2, 1.0, %v2407_v7  ;;  %v1934_v20 = vsel %vm121_vm3, 1.0, %v2407_v7 }
  0x80   :  { %2106 = vmatprep.mubr.msk.f32.mxu0 %vm205_vm1, %v1932_v17 }
  0x81   :  { %v52_v18 = vpop.permute.xlu0 %51  ;;  %v58_v19 = vpop.permute.xlu1 %57 }
  0x82   :  { %vm120_vm4 = vcmp.eq.s32.totalorder %v52_v18, %v2477_v14  ;;  %vm122_vm5 = vcmp.eq.s32.totalorder %v58_v19, %v2477_v14 }
  0x83   :  { %v1933_v21 = vsel %vm120_vm4, 1.0, %v2407_v7  ;;  %v1935_v22 = vsel %vm122_vm5, 1.0, %v2407_v7 }
  0x84   :  { %2107 = vmatmul.mubr.msk.f32.vlgmr.msra.gmra.mxu0 %vm205_vm1, %v1933_v21 }
  0x85   :  { %2109 = vmatprep.mubr.msk.f32.mxu0 %vm205_vm1, %v1934_v20  ;;  %2228 = vmatpush3.msra.mxu0 %v2538_v60 }
  0x86   :  { %2229 = vmatprep.subr.mxu0 %v2407_v7 }
  0x87   :  { %2230 = vmatpush3.msra.mxu0 %v2543_v61 }
  0x88   :  { %2110 = vmatmul.mubr.msk.f32.gmra.mxu0 %vm205_vm1, %v1935_v22  ;;  %2231 = vmatprep.subr.mxu0 %v2407_v7 }
  0x89   :  { %2232 = vmatpush3.msra.mxu0 %v2551_v62 }
  0x8a   :  { %2233 = vmatprep.subr.mxu0 %v2407_v7 }
  0x8b   :  { %2234 = vmatpush3.msra.mxu0 %v2565_v63 }
  0x8c   :  { %2261 = vmatprep.subr.mxu0 %v2407_v7 }
 0x144   :  { %v2108_v24 = vpop.f32.mrf.mxu0 }
 0x145   :  { %v354_v25 = vadd.f32 %v2108_v24, %v2494_v23 }
 0x146   :  { %v348_v26 = vpop.f32.mrf.mxu0 }
 0x147   :  { %v473_v27 = vmul.f32 0.5, %v354_v25  ;;  %v349_v28 = vadd.f32 %v2494_v23, %v348_v26 }
 0x148   :  { %v2499_v29 = vpop.f32.mrf.mxu0 }
 0x149   :  { %v476_v30 = vsel %vm471_vm6, %v354_v25, %v473_v27  ;;  %v472_v31 = vmul.f32 0.5, %v349_v28  ;;  %v364_v16 = vadd.f32 %v2499_v29, %v2494_v23 }
 0x14a   :  { %2283 = vtanh.f32 %v476_v30  ;;  %v358_v32 = vpop.f32.mrf.mxu0 }
 0x14b   :  { %v475_v33 = vsel %vm471_vm6, %v349_v28, %v472_v31  ;;  %v359_v34 = vadd.f32 %v2494_v23, %v358_v32 }
 0x14c   :  { %2285 = vtanh.f32 %v475_v33 }
 0x14d   :  { %v474_v35 = vmul.f32 0.5, %v359_v34 }
 0x14f   :  { %v477_v36 = vsel %vm471_vm6, %v359_v34, %v474_v35 }
 0x150   :  { %2287 = vtanh.f32 %v477_v36 }
 0x157   :  { %v2284_v37 = vpop.eup %2283 }
 0x158   :  { %v482_v38 = vadd.f32 1.0, %v2284_v37 }
 0x159   :  { %v2286_v39 = vpop.eup %2285 }
 0x15a   :  { %v485_v40 = vmul.f32 0.5, %v482_v38  ;;  %v481_v41 = vadd.f32 1.0, %v2286_v39 }
 0x15c   :  { %v488_v42 = vsel %vm471_vm6, %v2284_v37, %v485_v40  ;;  %v484_v43 = vmul.f32 0.5, %v481_v41 }
 0x15d   :  { %v2288_v44 = vpop.eup %2287  ;;  %495 = vrot.lane.b32.xlu1 %v488_v42, %s2408_s16 }
 0x15e   :  { %v487_v45 = vsel %vm471_vm6, %v2286_v39, %v484_v43  ;;  %v483_v46 = vadd.f32 1.0, %v2288_v44 }
 0x15f   :  { %493 = vrot.lane.b32.xlu0 %v487_v45, %s2408_s16 }
 0x160   :  { %v486_v47 = vmul.f32 0.5, %v483_v46 }
 0x162   :  { %v489_v48 = vsel %vm471_vm6, %v2288_v44, %v486_v47 }
 0x163   :  { %497 = vrot.lane.b32.xlu0 %v489_v48, %s2408_s16 }
 0x1cf   :  { %v496_v49 = vpop.permute.xlu1 %495 }
 0x1d0   :  { %v2517_v50 = vmul.f32 %v496_v49, %v488_v42 }
 0x1d1   :  { %v494_v51 = vpop.permute.xlu0 %493 }
 0x1d2   :  { %2289 = vtanh.f32 %v2517_v50  ;;  %v2520_v52 = vmul.f32 %v494_v51, %v487_v45 }
 0x1d4   :  { %2291 = vtanh.f32 %v2520_v52 }
 0x1d5   :  { %v498_v53 = vpop.permute.xlu0 %497 }
 0x1d6   :  { %v2523_v54 = vmul.f32 %v498_v53, %v489_v48 }
 0x1d8   :  { %2293 = vtanh.f32 %v2523_v54 }
 0x1df   :  { %v2290_v55 = vpop.eup %2289 }
 0x1e0   :  { %513 = vrot.lane.b32.xlu0 %v2290_v55, %s2409_s17 }
 0x1e1   :  { %v2292_v56 = vpop.eup %2291 }
 0x1e2   :  { %511 = vrot.lane.b32.xlu1 %v2292_v56, %s2409_s17 }
 0x1e4   :  { %60 = vperm.xlu0 %2281, %v25_v57  }
 0x1e5   :  { %v2294_v58 = vpop.eup %2293 }
 0x1e6   :  { %515 = vrot.lane.b32.xlu1 %v2294_v58, %s2409_s17 }
 0x1ea   :  { %63 = vperm.xlu1 %2282, %v26_v59  }
 0x252   :  { %v514_v0 = vpop.permute.xlu0 %513 }
 0x253   :  { %v2573_v1 = vmul.f32 %v514_v0, %v488_v42 }
 0x254   :  { %v512_v2 = vpop.permute.xlu1 %511 }
 0x255   :  { %v2575_v3 = vmul.f32 %v512_v2, %v487_v45  ;;  %528 = vrot.lane.b32.xlu1 %v2573_v1, %s2409_s17 }
 0x257   :  { %526 = vrot.lane.b32.xlu0 %v2575_v3, %s2409_s17 }
 0x258   :  { %v516_v4 = vpop.permute.xlu1 %515 }
 0x259   :  { %v2581_v5 = vmul.f32 %v516_v4, %v489_v48 }
 0x25b   :  { %530 = vrot.lane.b32.xlu0 %v2581_v5, %s2409_s17 }
 0x25f   :  { %v61_v6 = vpop.permute.xlu0 %60 }
 0x260   :  { %vm123_vm8 = vcmp.eq.s32.totalorder %v61_v6, %v2477_v14 }
 0x261   :  { %v1936_v8 = vsel %vm123_vm8, 1.0, %v2407_v7 }
 0x262   :  { %2112 = vmatprep.mubr.msk.f32.mxu0 %vm205_vm1, %v1936_v8 }
 0x265   :  { %v64_v9 = vpop.permute.xlu1 %63 }
 0x266   :  { %vm124_vm9 = vcmp.eq.s32.totalorder %v64_v9, %v2477_v14 }
 0x267   :  { %v1937_v10 = vsel %vm124_vm9, 1.0, %v2407_v7 }
 0x268   :  { %2113 = vmatmul.mubr.msk.f32.gmra.mxu0 %vm205_vm1, %v1937_v10 }
 0x2c7   :  { %v529_v12 = vpop.permute.xlu1 %528 }
 0x2c9   :  { %v527_v11 = vpop.permute.xlu0 %526 }
 0x2ca   :  { %2151 = vmatmul.mubr.msk.f32.vlgmr.msra.gmra.mxu1 %vm532_vm10, %v527_v11 }
 0x2cb   :  { %2153 = vmatprep.mubr.msk.f32.mxu1 %vm2410_vm7, %v2407_v7  ;;  %2160 = vmatpush3.msra.mxu1 %v2538_v60 }
 0x2cc   :  { %2161 = vmatprep.subr.mxu1 %v2407_v7 }
 0x2cd   :  { %2162 = vmatpush3.msra.mxu1 %v2543_v61  ;;  %v531_v13 = vpop.permute.xlu0 %530 }
 0x2ce   :  { %2154 = vmatmul.mubr.msk.f32.gmra.mxu1 %vm532_vm10, %v529_v12  ;;  %2163 = vmatprep.subr.mxu1 %v2407_v7  ;;  %v27_v12 = vld [vmem:[%s3191_s0 + $0x30] sm:$0xff] }
 0x2cf   :  { %2156 = vmatprep.mubr.msk.f32.mxu1 %vm2410_vm7, %v2407_v7  ;;  %2164 = vmatpush3.msra.mxu1 %v2551_v62 }
 0x2d0   :  { %2165 = vmatprep.subr.mxu1 %v2407_v7 }
 0x2d1   :  { %2166 = vmatpush3.msra.mxu1 %v2565_v63 }
 0x2d2   :  { %2157 = vmatmul.mubr.msk.f32.gmra.mxu1 %vm532_vm10, %v531_v13  ;;  %2176 = vmatprep.subr.mxu1 %v2407_v7 }
 0x2d3   :  { %2167 = vmatprep.mubr.msk.f32.mxu1 %vm2410_vm7, %v2407_v7 }
 0x328   :  { %v2114_v15 = vpop.f32.mrf.mxu0 }
 0x329   :  { %v374_v28 = vadd.f32 %v2114_v15, %v2494_v23  ;;  %v29_v15 = vld [vmem:[%s3191_s0 + $0x40] sm:$0xff] }
 0x32a   :  { %v368_v17 = vpop.f32.mrf.mxu0 }
 0x32b   :  { %v369_v21 = vadd.f32 %v2494_v23, %v368_v17  ;;  %v30_v17 = vld [vmem:[%s3191_s0 + $0x48] sm:$0xff] }
 0x38a   :  { %v605_v18 = vpop.f32.mrf.mxu1 }
 0x38b   :  { %v619_v19 = vadd.f32 %v605_v18, %v364_v16  ;;  %v28_v16 = vld [vmem:[%s3191_s0 + $0x38] sm:$0xff] }
 0x38c   :  { %v2152_v20 = vpop.f32.mrf.mxu1 }
 0x38d   :  { %v622_v22 = vmul.f32 0.5, %v619_v19 }
 0x38e   :  { %v610_v24 = vpop.f32.mrf.mxu1 }
 0x38f   :  { %v625_v25 = vsel %vm471_vm6, %v619_v19, %v622_v22  ;;  %v620_v26 = vadd.f32 %v610_v24, %v369_v21 }
 0x390   :  { %2295 = vtanh.f32 %v625_v25  ;;  %v2155_v27 = vpop.f32.mrf.mxu1 }
 0x391   :  { %v623_v30 = vmul.f32 0.5, %v620_v26 }
 0x392   :  { %v615_v31 = vpop.f32.mrf.mxu1 }
 0x393   :  { %v626_v29 = vsel %vm471_vm6, %v620_v26, %v623_v30  ;;  %v621_v32 = vadd.f32 %v615_v31, %v374_v28 }
 0x394   :  { %2297 = vtanh.f32 %v626_v29  ;;  %v2158_v33 = vpop.f32.mrf.mxu1 }
 0x395   :  { %v624_v34 = vmul.f32 0.5, %v621_v32 }
 0x397   :  { %v627_v35 = vsel %vm471_vm6, %v621_v32, %v624_v34 }
 0x398   :  { %2299 = vtanh.f32 %v627_v35 }
 0x39d   :  { %v2296_v36 = vpop.eup %2295 }
 0x39e   :  { %v631_v37 = vadd.f32 1.0, %v2296_v36 }
 0x3a0   :  { %v634_v38 = vmul.f32 0.5, %v631_v37 }
 0x3a1   :  { %v2298_v39 = vpop.eup %2297 }
 0x3a2   :  { %v637_v40 = vsel %vm471_vm6, %v2296_v36, %v634_v38  ;;  %v632_v41 = vadd.f32 1.0, %v2298_v39 }
 0x3a3   :  { %658 = vrot.lane.b32.xlu1 %v637_v40, %s2408_s16 }
 0x3a4   :  { %v635_v42 = vmul.f32 0.5, %v632_v41 }
 0x3a5   :  { %v2300_v43 = vpop.eup %2299 }
 0x3a6   :  { %v638_v44 = vsel %vm471_vm6, %v2298_v39, %v635_v42  ;;  %v633_v45 = vadd.f32 1.0, %v2300_v43 }
 0x3a7   :  { %660 = vrot.lane.b32.xlu0 %v638_v44, %s2408_s16 }
 0x3a8   :  { %v636_v46 = vmul.f32 0.5, %v633_v45 }
 0x3aa   :  { %v639_v47 = vsel %vm471_vm6, %v2300_v43, %v636_v46 }
 0x3ab   :  { %643 = vrot.lane.b32.xlu0 %v2520_v52, %s2408_s16  ;;  %662 = vrot.lane.b32.xlu1 %v639_v47, %s2408_s16 }
 0x3af   :  { %645 = vrot.lane.b32.xlu0 %v2517_v50, %s2408_s16 }
 0x3b3   :  { %647 = vrot.lane.b32.xlu0 %v2523_v54, %s2408_s16 }
 0x415   :  { %v659_v48 = vpop.permute.xlu1 %658 }
 0x416   :  { %v667_v49 = vmul.f32 %v659_v48, %v637_v40 }
 0x418   :  { %673 = vrot.lane.b32.xlu1 %v667_v49, %s2408_s16 }
 0x419   :  { %v661_v51 = vpop.permute.xlu0 %660 }
 0x41a   :  { %v668_v53 = vmul.f32 %v661_v51, %v638_v44 }
 0x41c   :  { %675 = vrot.lane.b32.xlu1 %v668_v53, %s2408_s16 }
 0x41d   :  { %v663_v55 = vpop.permute.xlu1 %662  ;;  %v644_v52 = vpop.permute.xlu0 %643 }
 0x41e   :  { %v669_v56 = vmul.f32 %v663_v55, %v639_v47  ;;  %v652_v58 = vmul.f32 %v644_v52, %v637_v40 }
 0x420   :  { %677 = vrot.lane.b32.xlu1 %v669_v56, %s2408_s16 }
 0x421   :  { %v646_v57 = vpop.permute.xlu0 %645 }
 0x422   :  { %v653_v0 = vmul.f32 %v646_v57, %v638_v44 }
 0x425   :  { %v648_v54 = vpop.permute.xlu0 %647 }
 0x426   :  { %v654_v6 = vmul.f32 %v648_v54, %v639_v47 }
 0x48a   :  { %v674_v59 = vpop.permute.xlu1 %673 }
 0x48b   :  { %v2636_v50 = vadd.f32 %v674_v59, %v652_v58 }
 0x48d   :  { %2301 = vtanh.f32 %v2636_v50 }
 0x48e   :  { %v676_v2 = vpop.permute.xlu1 %675 }
 0x48f   :  { %v2639_v4 = vadd.f32 %v676_v2, %v653_v0 }
 0x491   :  { %2303 = vtanh.f32 %v2639_v4 }
 0x492   :  { %v678_v8 = vpop.permute.xlu1 %677 }
 0x493   :  { %v2642_v9 = vadd.f32 %v678_v8, %v654_v6 }
 0x495   :  { %2305 = vtanh.f32 %v2642_v9 }
 0x49a   :  { %v2302_v10 = vpop.eup %2301 }
 0x49b   :  { %691 = vrot.lane.b32.xlu0 %v2302_v10, %s2408_s16 }
 0x49e   :  { %v2304_v11 = vpop.eup %2303 }
 0x49f   :  { %693 = vrot.lane.b32.xlu1 %v2304_v11, %s2408_s16 }
 0x4a2   :  { %v2306_v13 = vpop.eup %2305 }
 0x4a3   :  { %66 = vperm.xlu1 %2282, %v27_v12   ;;  %695 = vrot.lane.b32.xlu0 %v2306_v13, %s2408_s16 }
 0x4a7   :  { %72 = vperm.xlu1 %2282, %v29_v15   ;;  %69 = vperm.xlu0 %2281, %v28_v16  }
 0x4ab   :  { %75 = vperm.xlu0 %2281, %v30_v17  }
 0x50d   :  { %v692_v18 = vpop.permute.xlu0 %691 }
 0x50e   :  { %v2660_v19 = vmul.f32 %v692_v18, %v637_v40 }
 0x510   :  { %710 = vrot.lane.b32.xlu1 %v2660_v19, %s2409_s17 }
 0x511   :  { %v694_v20 = vpop.permute.xlu1 %693 }
 0x512   :  { %v2664_v21 = vmul.f32 %v694_v20, %v638_v44 }
 0x514   :  { %712 = vrot.lane.b32.xlu0 %v2664_v21, %s2409_s17 }
 0x515   :  { %v696_v22 = vpop.permute.xlu0 %695 }
 0x516   :  { %v2668_v24 = vmul.f32 %v696_v22, %v639_v47 }
 0x518   :  { %714 = vrot.lane.b32.xlu1 %v2668_v24, %s2409_s17 }
 0x51e   :  { %v67_v25 = vpop.permute.xlu1 %66 }
 0x51f   :  { %vm125_vm11 = vcmp.eq.s32.totalorder %v67_v25, %v2477_v14 }
 0x520   :  { %v1938_v26 = vsel %vm125_vm11, 1.0, %v2407_v7 }
 0x521   :  { %2115 = vmatprep.mubr.msk.f32.mxu0 %vm205_vm1, %v1938_v26 }
 0x522   :  { %v73_v27 = vpop.permute.xlu1 %72  ;;  %v70_v28 = vpop.permute.xlu0 %69 }
 0x523   :  { %vm127_vm12 = vcmp.eq.s32.totalorder %v73_v27, %v2477_v14  ;;  %vm126_vm13 = vcmp.eq.s32.totalorder %v70_v28, %v2477_v14 }
 0x524   :  { %v1940_v30 = vsel %vm127_vm12, 1.0, %v2407_v7  ;;  %v1939_v31 = vsel %vm126_vm13, 1.0, %v2407_v7 }
 0x525   :  { %2116 = vmatmul.mubr.msk.f32.gmra.mxu0 %vm205_vm1, %v1939_v31 }
 0x526   :  { %2118 = vmatprep.mubr.msk.f32.mxu0 %vm205_vm1, %v1940_v30  ;;  %v76_v29 = vpop.permute.xlu0 %75 }
 0x527   :  { %vm128_vm14 = vcmp.eq.s32.totalorder %v76_v29, %v2477_v14 }
 0x528   :  { %v1941_v32 = vsel %vm128_vm14, 1.0, %v2407_v7 }
 0x529   :  { %2119 = vmatmul.mubr.msk.f32.gmra.mxu0 %vm205_vm1, %v1941_v32 }
 0x582   :  { %v711_v33 = vpop.permute.xlu1 %710 }
 0x583   :  { %2168 = vmatmul.mubr.msk.f32.vlgmr.msra.gmra.mxu1 %vm532_vm10, %v711_v33 }
 0x584   :  { %2170 = vmatprep.mubr.msk.f32.mxu1 %vm2410_vm7, %v2407_v7  ;;  %2177 = vmatpush3.msra.mxu1 %v2538_v60 }
 0x585   :  { %2178 = vmatprep.subr.mxu1 %v2407_v7 }
 0x586   :  { %v713_v34 = vpop.permute.xlu0 %712  ;;  %2179 = vmatpush3.msra.mxu1 %v2543_v61 }
 0x587   :  { %2171 = vmatmul.mubr.msk.f32.gmra.mxu1 %vm532_vm10, %v713_v34  ;;  %2180 = vmatprep.subr.mxu1 %v2407_v7 }
 0x588   :  { %2173 = vmatprep.mubr.msk.f32.mxu1 %vm2410_vm7, %v2407_v7  ;;  %2181 = vmatpush3.msra.mxu1 %v2551_v62 }
 0x589   :  { %2182 = vmatprep.subr.mxu1 %v2407_v7 }
 0x58a   :  { %v715_v35 = vpop.permute.xlu1 %714  ;;  %2183 = vmatpush3.msra.mxu1 %v2565_v63 }
 0x58b   :  { %2174 = vmatmul.mubr.msk.f32.gmra.mxu1 %vm532_vm10, %v715_v35  ;;  %2193 = vmatprep.subr.mxu1 %v2407_v7 }
 0x58c   :  { %2184 = vmatprep.mubr.msk.f32.mxu1 %vm2410_vm7, %v2407_v7 }
 0x5e5   :  { %v2117_v36 = vpop.f32.mrf.mxu0 }
 0x5e6   :  { %v384_v43 = vadd.f32 %v2117_v36, %v2494_v23 }
 0x5e7   :  { %v378_v37 = vpop.f32.mrf.mxu0 }
 0x5e8   :  { %v379_v38 = vadd.f32 %v2494_v23, %v378_v37 }
 0x5e9   :  { %v2702_v39 = vpop.f32.mrf.mxu0 }
 0x5eb   :  { %v388_v45 = vpop.f32.mrf.mxu0 }
 0x5ec   :  { %v389_v51 = vadd.f32 %v2494_v23, %v388_v45 }
 0x643   :  { %v788_v40 = vpop.f32.mrf.mxu1 }
 0x644   :  { %v802_v41 = vadd.f32 %v788_v40, %v379_v38 }
 0x645   :  { %v2169_v42 = vpop.f32.mrf.mxu1 }
 0x646   :  { %v805_v44 = vmul.f32 0.5, %v802_v41  ;;  %v704_v42 = vadd.f32 %v2660_v19, %v2575_v3 }
 0x647   :  { %v793_v46 = vpop.f32.mrf.mxu1 }
 0x648   :  { %v808_v47 = vsel %vm471_vm6, %v802_v41, %v805_v44  ;;  %v803_v48 = vadd.f32 %v793_v46, %v384_v43  ;;  %v703_v41 = vmax.f32 %v2575_v3, %v2660_v19  ;;  %v706_v3 = vadd.f32 %v2668_v24, %v2581_v5 }
 0x649   :  { %2307 = vtanh.f32 %v808_v47  ;;  %v2172_v49 = vpop.f32.mrf.mxu1  ;;  %v705_v47 = vadd.f32 %v2664_v21, %v2573_v1 }
 0x64a   :  { %v806_v53 = vmul.f32 0.5, %v803_v48 }
 0x64b   :  { %v798_v55 = vpop.f32.mrf.mxu1 }
 0x64c   :  { %v809_v56 = vsel %vm471_vm6, %v803_v48, %v806_v53  ;;  %v804_v52 = vadd.f32 %v798_v55, %v389_v51 }
 0x64d   :  { %2309 = vtanh.f32 %v809_v56  ;;  %v2175_v57 = vpop.f32.mrf.mxu1 }
 0x64e   :  { %v807_v58 = vmul.f32 0.5, %v804_v52 }
 0x650   :  { %v810_v59 = vsel %vm471_vm6, %v804_v52, %v807_v58  ;;  %v394_v58 = vadd.f32 %v2702_v39, %v2494_v23 }
 0x651   :  { %2311 = vtanh.f32 %v810_v59 }
 0x656   :  { %v2308_v0 = vpop.eup %2307 }
 0x657   :  { %v814_v54 = vadd.f32 1.0, %v2308_v0 }
 0x659   :  { %v817_v2 = vmul.f32 0.5, %v814_v54 }
 0x65a   :  { %v2310_v6 = vpop.eup %2309 }
 0x65b   :  { %v820_v8 = vsel %vm471_vm6, %v2308_v0, %v817_v2  ;;  %v815_v10 = vadd.f32 1.0, %v2310_v6 }
 0x65c   :  { %829 = vrot.lane.b32.xlu0 %v820_v8, %s2408_s16  ;;  %v823_v28 = vmul.f32 %v820_v8, %v2636_v50 }
 0x65d   :  { %v818_v11 = vmul.f32 0.5, %v815_v10 }
 0x65e   :  { %v2312_v12 = vpop.eup %2311 }
 0x65f   :  { %v821_v13 = vsel %vm471_vm6, %v2310_v6, %v818_v11  ;;  %v816_v15 = vadd.f32 1.0, %v2312_v12 }
 0x660   :  { %831 = vrot.lane.b32.xlu1 %v821_v13, %s2408_s16  ;;  %v824_v29 = vmul.f32 %v821_v13, %v2639_v4  ;;  %v31_v4 = vld [vmem:[%s3191_s0 + $0x50] sm:$0xff] }
 0x661   :  { %v819_v16 = vmul.f32 0.5, %v816_v15 }
 0x663   :  { %v822_v17 = vsel %vm471_vm6, %v2312_v12, %v819_v16 }
 0x664   :  { %833 = vrot.lane.b32.xlu0 %v822_v17, %s2408_s16  ;;  %v825_v34 = vmul.f32 %v822_v17, %v2642_v9  ;;  %v32_v9 = vld [vmem:[%s3191_s0 + $0x58] sm:$0xff] }
 0x6ce   :  { %v830_v18 = vpop.permute.xlu0 %829 }
 0x6cf   :  { %v838_v20 = vmul.f32 %v830_v18, %v820_v8 }
 0x6d1   :  { %844 = vrot.lane.b32.xlu1 %v838_v20, %s2408_s16 }
 0x6d2   :  { %v832_v22 = vpop.permute.xlu1 %831 }
 0x6d3   :  { %v839_v25 = vmul.f32 %v832_v22, %v821_v13 }
 0x6d5   :  { %846 = vrot.lane.b32.xlu0 %v839_v25, %s2408_s16 }
 0x6d6   :  { %v834_v26 = vpop.permute.xlu0 %833 }
 0x6d7   :  { %v840_v27 = vmul.f32 %v834_v26, %v822_v17 }
 0x6d9   :  { %848 = vrot.lane.b32.xlu1 %v840_v27, %s2408_s16 }
 0x743   :  { %v845_v30 = vpop.permute.xlu1 %844 }
 0x744   :  { %v2725_v31 = vadd.f32 %v845_v30, %v823_v28 }
 0x746   :  { %2313 = vtanh.f32 %v2725_v31 }
 0x747   :  { %v847_v32 = vpop.permute.xlu0 %846 }
 0x748   :  { %v2729_v33 = vadd.f32 %v847_v32, %v824_v29 }
 0x74a   :  { %2315 = vtanh.f32 %v2729_v33 }
 0x74b   :  { %v849_v35 = vpop.permute.xlu1 %848 }
 0x74c   :  { %v2733_v36 = vadd.f32 %v849_v35, %v825_v34 }
 0x74e   :  { %2317 = vtanh.f32 %v2733_v36 }
 0x753   :  { %v2314_v50 = vpop.eup %2313 }
 0x754   :  { %862 = vrot.lane.b32.xlu0 %v2314_v50, %s2408_s16 }
 0x757   :  { %v2316_v37 = vpop.eup %2315 }
 0x758   :  { %864 = vrot.lane.b32.xlu1 %v2316_v37, %s2408_s16 }
 0x75b   :  { %v2318_v38 = vpop.eup %2317 }
 0x75c   :  { %866 = vrot.lane.b32.xlu0 %v2318_v38, %s2408_s16  ;;  %78 = vperm.xlu1 %2282, %v31_v4  }
 0x760   :  { %81 = vperm.xlu0 %2281, %v32_v9  }
 0x7c6   :  { %v863_v40 = vpop.permute.xlu0 %862 }
 0x7c7   :  { %v871_v43 = vmul.f32 %v863_v40, %v820_v8 }
 0x7c9   :  { %v2749_v44 = vmax.f32 %v703_v41, %v871_v43  ;;  %v2751_v45 = vadd.f32 %v871_v43, %v704_v42  ;;  %881 = vrot.lane.b32.xlu1 %v871_v43, %s2409_s17 }
 0x7ca   :  { %v865_v46 = vpop.permute.xlu1 %864 }
 0x7cb   :  { %v872_v48 = vmul.f32 %v865_v46, %v821_v13 }
 0x7cd   :  { %v2756_v49 = vadd.f32 %v872_v48, %v705_v47  ;;  %883 = vrot.lane.b32.xlu0 %v872_v48, %s2409_s17 }
 0x7ce   :  { %v867_v51 = vpop.permute.xlu0 %866 }
 0x7cf   :  { %v873_v19 = vmul.f32 %v867_v51, %v822_v17 }
 0x7d1   :  { %v2761_v53 = vadd.f32 %v873_v19, %v706_v3  ;;  %885 = vrot.lane.b32.xlu1 %v873_v19, %s2409_s17 }
 0x7d7   :  { %v79_v55 = vpop.permute.xlu1 %78 }
 0x7d8   :  { %vm129_vm15 = vcmp.eq.s32.totalorder %v79_v55, %v2477_v14 }
 0x7d9   :  { %v1942_v56 = vsel %vm129_vm15, 1.0, %v2407_v7 }
 0x7da   :  { %2121 = vmatprep.mubr.msk.f32.mxu0 %vm205_vm1, %v1942_v56 }
 0x7db   :  { %v82_v1 = vpop.permute.xlu0 %81 }
 0x7dc   :  { %vm130_vm0 = vcmp.eq.s32.totalorder %v82_v1, %v2477_v14 }
 0x7dd   :  { %v1943_v21 = vsel %vm130_vm0, 1.0, %v2407_v7 }
 0x7de   :  { %2122 = vmatmul.mubr.msk.f32.gmra.mxu0 %vm205_vm1, %v1943_v21 }
 0x83b   :  { %v882_v5 = vpop.permute.xlu1 %881 }
 0x83c   :  { %2185 = vmatmul.mubr.msk.f32.vlgmr.msra.gmra.mxu1 %vm532_vm10, %v882_v5 }
 0x83d   :  { %2187 = vmatprep.mubr.msk.f32.mxu1 %vm2410_vm7, %v2407_v7  ;;  %2194 = vmatpush3.msra.mxu1 %v2538_v60 }
 0x83e   :  { %2195 = vmatprep.subr.mxu1 %v2407_v7 }
 0x83f   :  { %v884_v24 = vpop.permute.xlu0 %883  ;;  %2196 = vmatpush3.msra.mxu1 %v2543_v61 }
 0x840   :  { %2188 = vmatmul.mubr.msk.f32.gmra.mxu1 %vm532_vm10, %v884_v24  ;;  %2197 = vmatprep.subr.mxu1 %v2407_v7 }
 0x841   :  { %2190 = vmatprep.mubr.msk.f32.mxu1 %vm2410_vm7, %v2407_v7  ;;  %2198 = vmatpush3.msra.mxu1 %v2551_v62 }
 0x842   :  { %2199 = vmatprep.subr.mxu1 %v2407_v7 }
 0x843   :  { %v886_v52 = vpop.permute.xlu1 %885  ;;  %2200 = vmatpush3.msra.mxu1 %v2565_v63 }
 0x844   :  { %2191 = vmatmul.mubr.msk.f32.gmra.mxu1 %vm532_vm10, %v886_v52  ;;  %2210 = vmatprep.subr.mxu1 %v2407_v7  ;;  %v35_v52 = vld [vmem:[%s3191_s0 + $0x70] sm:$0xff] }
 0x845   :  { %2201 = vmatprep.mubr.msk.f32.mxu1 %vm2410_vm7, %v2407_v7 }
 0x89e   :  { %v2123_v57 = vpop.f32.mrf.mxu0 }
 0x89f   :  { %v404_v15 = vadd.f32 %v2123_v57, %v2494_v23  ;;  %v36_v57 = vld [vmem:[%s3191_s0 + $0x78] sm:$0xff] }
 0x8a0   :  { %v398_v59 = vpop.f32.mrf.mxu0 }
 0x8a1   :  { %v399_v6 = vadd.f32 %v2494_v23, %v398_v59 }
 0x8fc   :  { %v959_v0 = vpop.f32.mrf.mxu1 }
 0x8fd   :  { %v973_v54 = vadd.f32 %v959_v0, %v394_v58 }
 0x8fe   :  { %v2186_v2 = vpop.f32.mrf.mxu1 }
 0x8ff   :  { %v976_v8 = vmul.f32 0.5, %v973_v54 }
 0x900   :  { %v964_v10 = vpop.f32.mrf.mxu1 }
 0x901   :  { %v979_v11 = vsel %vm471_vm6, %v973_v54, %v976_v8  ;;  %v974_v12 = vadd.f32 %v964_v10, %v399_v6 }
 0x902   :  { %2319 = vtanh.f32 %v979_v11  ;;  %v2189_v13 = vpop.f32.mrf.mxu1 }
 0x903   :  { %v977_v16 = vmul.f32 0.5, %v974_v12 }
 0x904   :  { %v969_v17 = vpop.f32.mrf.mxu1 }
 0x905   :  { %v980_v39 = vsel %vm471_vm6, %v974_v12, %v977_v16  ;;  %v975_v18 = vadd.f32 %v969_v17, %v404_v15 }
 0x906   :  { %2321 = vtanh.f32 %v980_v39  ;;  %v2192_v20 = vpop.f32.mrf.mxu1 }
 0x907   :  { %v978_v22 = vmul.f32 0.5, %v975_v18 }
 0x909   :  { %v981_v25 = vsel %vm471_vm6, %v975_v18, %v978_v22 }
 0x90a   :  { %2323 = vtanh.f32 %v981_v25 }
 0x90f   :  { %v2320_v26 = vpop.eup %2319 }
 0x910   :  { %v985_v27 = vadd.f32 1.0, %v2320_v26 }
 0x912   :  { %v988_v28 = vmul.f32 0.5, %v985_v27 }
 0x913   :  { %v2322_v30 = vpop.eup %2321 }
 0x914   :  { %v991_v29 = vsel %vm471_vm6, %v2320_v26, %v988_v28  ;;  %v986_v32 = vadd.f32 1.0, %v2322_v30 }
 0x915   :  { %1000 = vrot.lane.b32.xlu0 %v991_v29, %s2408_s16  ;;  %v994_v47 = vmul.f32 %v991_v29, %v2725_v31 }
 0x916   :  { %v989_v34 = vmul.f32 0.5, %v986_v32 }
 0x917   :  { %v2324_v35 = vpop.eup %2323 }
 0x918   :  { %v992_v50 = vsel %vm471_vm6, %v2322_v30, %v989_v34  ;;  %v987_v37 = vadd.f32 1.0, %v2324_v35 }
 0x919   :  { %1002 = vrot.lane.b32.xlu1 %v992_v50, %s2408_s16  ;;  %v995_v3 = vmul.f32 %v992_v50, %v2729_v33  ;;  %v33_v33 = vld [vmem:[%s3191_s0 + $0x60] sm:$0xff] }
 0x91a   :  { %v990_v4 = vmul.f32 0.5, %v987_v37 }
 0x91c   :  { %v993_v38 = vsel %vm471_vm6, %v2324_v35, %v990_v4 }
 0x91d   :  { %1004 = vrot.lane.b32.xlu0 %v993_v38, %s2408_s16  ;;  %v996_v56 = vmul.f32 %v993_v38, %v2733_v36  ;;  %v34_v36 = vld [vmem:[%s3191_s0 + $0x68] sm:$0xff] }
 0x987   :  { %v1001_v9 = vpop.permute.xlu0 %1000 }
 0x988   :  { %v1009_v40 = vmul.f32 %v1001_v9, %v991_v29 }
 0x98a   :  { %1015 = vrot.lane.b32.xlu1 %v1009_v40, %s2408_s16 }
 0x98b   :  { %v1003_v41 = vpop.permute.xlu1 %1002 }
 0x98c   :  { %v1010_v42 = vmul.f32 %v1003_v41, %v992_v50 }
 0x98e   :  { %1017 = vrot.lane.b32.xlu0 %v1010_v42, %s2408_s16 }
 0x98f   :  { %v1005_v43 = vpop.permute.xlu0 %1004 }
 0x990   :  { %v1011_v46 = vmul.f32 %v1005_v43, %v993_v38 }
 0x992   :  { %1019 = vrot.lane.b32.xlu1 %v1011_v46, %s2408_s16 }
 0x9fc   :  { %v1016_v48 = vpop.permute.xlu1 %1015 }
 0x9fd   :  { %v2810_v51 = vadd.f32 %v1016_v48, %v994_v47 }
 0x9ff   :  { %2325 = vtanh.f32 %v2810_v51 }
 0xa00   :  { %v1018_v19 = vpop.permute.xlu0 %1017 }
 0xa01   :  { %v2814_v55 = vadd.f32 %v1018_v19, %v995_v3 }
 0xa03   :  { %2327 = vtanh.f32 %v2814_v55 }
 0xa04   :  { %v1020_v1 = vpop.permute.xlu1 %1019 }
 0xa05   :  { %v2818_v21 = vadd.f32 %v1020_v1, %v996_v56 }
 0xa07   :  { %2329 = vtanh.f32 %v2818_v21 }
 0xa0c   :  { %v2326_v31 = vpop.eup %2325 }
 0xa0d   :  { %1033 = vrot.lane.b32.xlu0 %v2326_v31, %s2408_s16 }
 0xa10   :  { %v2328_v5 = vpop.eup %2327 }
 0xa11   :  { %1035 = vrot.lane.b32.xlu1 %v2328_v5, %s2408_s16 }
 0xa14   :  { %v2330_v24 = vpop.eup %2329 }
 0xa15   :  { %1037 = vrot.lane.b32.xlu0 %v2330_v24, %s2408_s16  ;;  %84 = vperm.xlu1 %2282, %v33_v33  }
 0xa19   :  { %87 = vperm.xlu0 %2281, %v34_v36   ;;  %90 = vperm.xlu1 %2282, %v35_v52  }
 0xa1d   :  { %93 = vperm.xlu0 %2281, %v36_v57  }
 0xa7f   :  { %v1034_v58 = vpop.permute.xlu0 %1033 }
 0xa80   :  { %v2836_v59 = vmul.f32 %v1034_v58, %v991_v29 }
 0xa82   :  { %v1045_v0 = vmax.f32 %v2749_v44, %v2836_v59  ;;  %v2842_v54 = vadd.f32 %v2836_v59, %v2751_v45  ;;  %1052 = vrot.lane.b32.xlu1 %v2836_v59, %s2409_s17 }
 0xa83   :  { %v1036_v2 = vpop.permute.xlu1 %1035 }
 0xa84   :  { %v1043_v6 = vmul.f32 %v1036_v2, %v992_v50 }
 0xa86   :  { %v2847_v8 = vadd.f32 %v1043_v6, %v2756_v49  ;;  %1054 = vrot.lane.b32.xlu0 %v1043_v6, %s2409_s17 }
 0xa87   :  { %v1038_v10 = vpop.permute.xlu0 %1037 }
 0xa88   :  { %v1044_v11 = vmul.f32 %v1038_v10, %v993_v38 }
 0xa8a   :  { %v2851_v12 = vadd.f32 %v1044_v11, %v2761_v53  ;;  %1056 = vrot.lane.b32.xlu1 %v1044_v11, %s2409_s17 }
 0xa90   :  { %v85_v13 = vpop.permute.xlu1 %84 }
 0xa91   :  { %vm131_vm2 = vcmp.eq.s32.totalorder %v85_v13, %v2477_v14 }
 0xa92   :  { %v1944_v45 = vsel %vm131_vm2, 1.0, %v2407_v7  ;;  %vm1830_vm2 = vcmask 258048  }
 0xa93   :  { %2124 = vmatprep.mubr.msk.f32.mxu0 %vm205_vm1, %v1944_v45 }
 0xa94   :  { %v91_v15 = vpop.permute.xlu1 %90  ;;  %v88_v16 = vpop.permute.xlu0 %87 }
 0xa95   :  { %vm133_vm3 = vcmp.eq.s32.totalorder %v91_v15, %v2477_v14  ;;  %vm132_vm4 = vcmp.eq.s32.totalorder %v88_v16, %v2477_v14 }
 0xa96   :  { %v1946_v49 = vsel %vm133_vm3, 1.0, %v2407_v7  ;;  %v1945_v53 = vsel %vm132_vm4, 1.0, %v2407_v7 }
 0xa97   :  { %2125 = vmatmul.mubr.msk.f32.gmra.mxu0 %vm205_vm1, %v1945_v53 }
 0xa98   :  { %2127 = vmatprep.mubr.msk.f32.mxu0 %vm205_vm1, %v1946_v49  ;;  %v94_v17 = vpop.permute.xlu0 %93 }
 0xa99   :  { %vm134_vm5 = vcmp.eq.s32.totalorder %v94_v17, %v2477_v14 }
 0xa9a   :  { %v1947_v39 = vsel %vm134_vm5, 1.0, %v2407_v7 }
 0xa9b   :  { %2128 = vmatmul.mubr.msk.f32.gmra.mxu0 %vm205_vm1, %v1947_v39 }
 0xaf4   :  { %v1053_v18 = vpop.permute.xlu1 %1052 }
 0xaf5   :  { %2202 = vmatmul.mubr.msk.f32.vlgmr.msra.gmra.mxu1 %vm532_vm10, %v1053_v18 }
 0xaf6   :  { %2204 = vmatprep.mubr.msk.f32.mxu1 %vm2410_vm7, %v2407_v7  ;;  %2211 = vmatpush3.msra.mxu1 %v2538_v60 }
 0xaf7   :  { %2212 = vmatprep.subr.mxu1 %v2407_v7 }
 0xaf8   :  { %v1055_v20 = vpop.permute.xlu0 %1054  ;;  %2213 = vmatpush3.msra.mxu1 %v2543_v61 }
 0xaf9   :  { %2205 = vmatmul.mubr.msk.f32.gmra.mxu1 %vm532_vm10, %v1055_v20  ;;  %2214 = vmatprep.subr.mxu1 %v2407_v7 }
 0xafa   :  { %2207 = vmatprep.mubr.msk.f32.mxu1 %vm2410_vm7, %v2407_v7  ;;  %2215 = vmatpush3.msra.mxu1 %v2551_v62 }
 0xafb   :  { %2216 = vmatprep.subr.mxu1 %v2407_v7 }
 0xafc   :  { %v1057_v22 = vpop.permute.xlu1 %1056  ;;  %2217 = vmatpush3.msra.mxu1 %v2565_v63 }
 0xafd   :  { %2208 = vmatmul.mubr.msk.f32.gmra.mxu1 %vm532_vm10, %v1057_v22  ;;  %2244 = vmatprep.subr.mxu1 %v2407_v7 }
 0xafe   :  { %2218 = vmatprep.mubr.msk.f32.mxu1 %vm2410_vm7, %v2407_v7 }
 0xb57   :  { %v2126_v25 = vpop.f32.mrf.mxu0 }
 0xb58   :  { %v414_v34 = vadd.f32 %v2126_v25, %v2494_v23 }
 0xb59   :  { %v408_v26 = vpop.f32.mrf.mxu0 }
 0xb5a   :  { %v409_v27 = vadd.f32 %v2494_v23, %v408_v26 }
 0xb5b   :  { %v2884_v28 = vpop.f32.mrf.mxu0 }
 0xb5d   :  { %v418_v50 = vpop.f32.mrf.mxu0 }
 0xb5e   :  { %v419_v40 = vadd.f32 %v2494_v23, %v418_v50 }
 0xbb5   :  { %v1130_v30 = vpop.f32.mrf.mxu1 }
 0xbb6   :  { %v1144_v29 = vadd.f32 %v1130_v30, %v409_v27 }
 0xbb7   :  { %v2203_v32 = vpop.f32.mrf.mxu1 }
 0xbb8   :  { %v1147_v35 = vmul.f32 0.5, %v1144_v29 }
 0xbb9   :  { %v1135_v37 = vpop.f32.mrf.mxu1 }
 0xbba   :  { %v1150_v4 = vsel %vm471_vm6, %v1144_v29, %v1147_v35  ;;  %v1145_v38 = vadd.f32 %v1135_v37, %v414_v34 }
 0xbbb   :  { %2331 = vtanh.f32 %v1150_v4  ;;  %v2206_v9 = vpop.f32.mrf.mxu1 }
 0xbbc   :  { %v1148_v41 = vmul.f32 0.5, %v1145_v38 }
 0xbbd   :  { %v1140_v42 = vpop.f32.mrf.mxu1 }
 0xbbe   :  { %v1151_v43 = vsel %vm471_vm6, %v1145_v38, %v1148_v41  ;;  %v1146_v46 = vadd.f32 %v1140_v42, %v419_v40 }
 0xbbf   :  { %2333 = vtanh.f32 %v1151_v43  ;;  %v2209_v47 = vpop.f32.mrf.mxu1 }
 0xbc0   :  { %v1149_v48 = vmul.f32 0.5, %v1146_v46 }
 0xbc2   :  { %v1152_v3 = vsel %vm471_vm6, %v1146_v46, %v1149_v48 }
 0xbc3   :  { %2335 = vtanh.f32 %v1152_v3 }
 0xbc8   :  { %v2332_v19 = vpop.eup %2331 }
 0xbc9   :  { %v1156_v56 = vadd.f32 1.0, %v2332_v19 }
 0xbcb   :  { %v1159_v1 = vmul.f32 0.5, %v1156_v56 }
 0xbcc   :  { %v2334_v31 = vpop.eup %2333 }
 0xbcd   :  { %v1162_v23 = vsel %vm471_vm6, %v2332_v19, %v1159_v1  ;;  %v1157_v5 = vadd.f32 1.0, %v2334_v31 }
 0xbce   :  { %1171 = vrot.lane.b32.xlu0 %v1162_v23, %s2408_s16  ;;  %v1165_v15 = vmul.f32 %v1162_v23, %v2810_v51 }
 0xbcf   :  { %v1160_v33 = vmul.f32 0.5, %v1157_v5 }
 0xbd0   :  { %v2336_v24 = vpop.eup %2335 }
 0xbd1   :  { %v1163_v36 = vsel %vm471_vm6, %v2334_v31, %v1160_v33  ;;  %v1158_v52 = vadd.f32 1.0, %v2336_v24 }
 0xbd2   :  { %1173 = vrot.lane.b32.xlu1 %v1163_v36, %s2408_s16  ;;  %v1166_v53 = vmul.f32 %v1163_v36, %v2814_v55  ;;  %v37_v55 = vld [vmem:[%s3191_s0 + $0x80] sm:$0xff] }
 0xbd3   :  { %v1161_v57 = vmul.f32 0.5, %v1158_v52 }
 0xbd5   :  { %v1164_v58 = vsel %vm471_vm6, %v2336_v24, %v1161_v57 }
 0xbd6   :  { %1175 = vrot.lane.b32.xlu0 %v1164_v58, %s2408_s16  ;;  %v1167_v18 = vmul.f32 %v1164_v58, %v2818_v21  ;;  %v38_v21 = vld [vmem:[%s3191_s0 + $0x88] sm:$0xff] }
 0xc40   :  { %v1172_v2 = vpop.permute.xlu0 %1171 }
 0xc41   :  { %v1180_v6 = vmul.f32 %v1172_v2, %v1162_v23 }
 0xc43   :  { %1186 = vrot.lane.b32.xlu1 %v1180_v6, %s2408_s16 }
 0xc44   :  { %v1174_v10 = vpop.permute.xlu1 %1173 }
 0xc45   :  { %v1181_v11 = vmul.f32 %v1174_v10, %v1163_v36 }
 0xc47   :  { %1188 = vrot.lane.b32.xlu0 %v1181_v11, %s2408_s16 }
 0xc48   :  { %v1176_v13 = vpop.permute.xlu0 %1175 }
 0xc49   :  { %v1182_v45 = vmul.f32 %v1176_v13, %v1164_v58 }
 0xc4b   :  { %1190 = vrot.lane.b32.xlu1 %v1182_v45, %s2408_s16 }
 0xcb5   :  { %v1187_v16 = vpop.permute.xlu1 %1186 }
 0xcb6   :  { %v2907_v49 = vadd.f32 %v1187_v16, %v1165_v15 }
 0xcb8   :  { %2337 = vtanh.f32 %v2907_v49 }
 0xcb9   :  { %v1189_v17 = vpop.permute.xlu0 %1188 }
 0xcba   :  { %v2911_v39 = vadd.f32 %v1189_v17, %v1166_v53 }
 0xcbc   :  { %2339 = vtanh.f32 %v2911_v39 }
 0xcbd   :  { %v1191_v20 = vpop.permute.xlu1 %1190 }
 0xcbe   :  { %v2915_v22 = vadd.f32 %v1191_v20, %v1167_v18 }
 0xcc0   :  { %2341 = vtanh.f32 %v2915_v22 }
 0xcc5   :  { %v2338_v51 = vpop.eup %2337 }
 0xcc6   :  { %1204 = vrot.lane.b32.xlu0 %v2338_v51, %s2408_s16 }
 0xcc9   :  { %v2340_v25 = vpop.eup %2339 }
 0xcca   :  { %1206 = vrot.lane.b32.xlu1 %v2340_v25, %s2408_s16 }
 0xccd   :  { %v2342_v26 = vpop.eup %2341 }
 0xcce   :  { %1208 = vrot.lane.b32.xlu0 %v2342_v26, %s2408_s16  ;;  %96 = vperm.xlu1 %2282, %v37_v55  }
 0xcd2   :  { %99 = vperm.xlu0 %2281, %v38_v21  }
 0xd38   :  { %v1205_v27 = vpop.permute.xlu0 %1204 }
 0xd39   :  { %v1213_v30 = vmul.f32 %v1205_v27, %v1162_v23 }
 0xd3b   :  { %v2930_v29 = vmax.f32 %v1045_v0, %v1213_v30  ;;  %v2933_v32 = vadd.f32 %v1213_v30, %v2842_v54  ;;  %1223 = vrot.lane.b32.xlu1 %v1213_v30, %s2409_s17 }
 0xd3c   :  { %v1207_v34 = vpop.permute.xlu1 %1206 }
 0xd3d   :  { %v1214_v35 = vmul.f32 %v1207_v34, %v1163_v36 }
 0xd3f   :  { %v2937_v50 = vadd.f32 %v1214_v35, %v2847_v8  ;;  %1225 = vrot.lane.b32.xlu0 %v1214_v35, %s2409_s17 }
 0xd40   :  { %v1209_v37 = vpop.permute.xlu0 %1208 }
 0xd41   :  { %v1215_v4 = vmul.f32 %v1209_v37, %v1164_v58 }
 0xd43   :  { %v2941_v38 = vadd.f32 %v1215_v4, %v2851_v12  ;;  %1227 = vrot.lane.b32.xlu1 %v1215_v4, %s2409_s17 }
 0xd49   :  { %v97_v44 = vpop.permute.xlu1 %96 }
 0xd4a   :  { %vm135_vm8 = vcmp.eq.s32.totalorder %v97_v44, %v2477_v14 }
 0xd4b   :  { %v1948_v59 = vsel %vm135_vm8, 1.0, %v2407_v7 }
 0xd4c   :  { %2130 = vmatprep.mubr.msk.f32.mxu0 %vm205_vm1, %v1948_v59 }
 0xd4d   :  { %v100_v0 = vpop.permute.xlu0 %99 }
 0xd4e   :  { %vm136_vm9 = vcmp.eq.s32.totalorder %v100_v0, %v2477_v14  ;;  %v41_v0 = vld [vmem:[%s3191_s0 + $0xa0] sm:$0xff] }
 0xd4f   :  { %v1949_v54 = vsel %vm136_vm9, 1.0, %v2407_v7 }
 0xd50   :  { %2131 = vmatmul.mubr.msk.f32.gmra.mxu0 %vm205_vm1, %v1949_v54  ;;  %v42_v54 = vld [vmem:[%s3191_s0 + $0xa8] sm:$0xff] }
 0xdad   :  { %v1224_v8 = vpop.permute.xlu1 %1223 }
 0xdae   :  { %2219 = vmatmul.mubr.msk.f32.vlgmr.msra.gmra.mxu1 %vm532_vm10, %v1224_v8  ;;  %v43_v8 = vld [vmem:[%s3191_s0 + $0xb0] sm:$0xff] }
 0xdaf   :  { %2221 = vmatprep.mubr.msk.f32.mxu1 %vm2410_vm7, %v2407_v7  ;;  %2245 = vmatpush3.msra.mxu1 %v2538_v60 }
 0xdb0   :  { %2246 = vmatprep.subr.mxu1 %v2407_v7 }
 0xdb1   :  { %v1226_v12 = vpop.permute.xlu0 %1225  ;;  %2247 = vmatpush3.msra.mxu1 %v2543_v61  ;;  %v2969_v61 = vld [vmem:[%s3194_s3] ss:$0 sm:$0xff] }
 0xdb2   :  { %2222 = vmatmul.mubr.msk.f32.gmra.mxu1 %vm532_vm10, %v1226_v12  ;;  %2248 = vmatprep.subr.mxu1 %v2407_v7  ;;  %v424_v40 = vadd.f32 %v2969_v61, %v2884_v28  ;;  %v44_v12 = vld [vmem:[%s3191_s0 + $0xb8] sm:$0xff] }
 0xdb3   :  { %2224 = vmatprep.mubr.msk.f32.mxu1 %vm2410_vm7, %v2407_v7  ;;  %2249 = vmatpush3.msra.mxu1 %v2551_v62 }
 0xdb4   :  { %2250 = vmatprep.subr.mxu1 %v2407_v7 }
 0xdb5   :  { %v1228_v9 = vpop.permute.xlu1 %1227  ;;  %2251 = vmatpush3.msra.mxu1 %v2565_v63 }
 0xdb6   :  { %2225 = vmatmul.mubr.msk.f32.gmra.mxu1 %vm532_vm10, %v1228_v9 }
 0xdb7   :  { %2252 = vmatprep.mubr.msk.f32.mxu1 %vm2410_vm7, %v2407_v7 }
 0xe10   :  { %v2132_v60 = vpop.f32.mrf.mxu0 }
 0xe11   :  { %v434_v56 = vadd.f32 %v2969_v61, %v2132_v60 }
 0xe12   :  { %v428_v62 = vpop.f32.mrf.mxu0 }
 0xe13   :  { %v429_v63 = vadd.f32 %v2969_v61, %v428_v62 }
 0xe6e   :  { %v1301_v41 = vpop.f32.mrf.mxu1 }
 0xe6f   :  { %v1315_v42 = vadd.f32 %v1301_v41, %v424_v40 }
 0xe70   :  { %v2220_v43 = vpop.f32.mrf.mxu1 }
 0xe71   :  { %v1318_v46 = vmul.f32 0.5, %v1315_v42 }
 0xe72   :  { %v1306_v47 = vpop.f32.mrf.mxu1 }
 0xe73   :  { %v1321_v48 = vsel %vm471_vm6, %v1315_v42, %v1318_v46  ;;  %v1316_v3 = vadd.f32 %v1306_v47, %v429_v63 }
 0xe74   :  { %2343 = vtanh.f32 %v1321_v48  ;;  %v2223_v19 = vpop.f32.mrf.mxu1 }
 0xe75   :  { %v1319_v1 = vmul.f32 0.5, %v1316_v3 }
 0xe76   :  { %v1311_v31 = vpop.f32.mrf.mxu1 }
 0xe77   :  { %v1322_v28 = vsel %vm471_vm6, %v1316_v3, %v1319_v1  ;;  %v1317_v23 = vadd.f32 %v1311_v31, %v434_v56 }
 0xe78   :  { %2345 = vtanh.f32 %v1322_v28  ;;  %v2226_v5 = vpop.f32.mrf.mxu1 }
 0xe79   :  { %v1320_v33 = vmul.f32 0.5, %v1317_v23 }
 0xe7b   :  { %v1323_v24 = vsel %vm471_vm6, %v1317_v23, %v1320_v33 }
 0xe7c   :  { %2347 = vtanh.f32 %v1323_v24 }
 0xe81   :  { %v2344_v36 = vpop.eup %2343 }
 0xe82   :  { %v1327_v52 = vadd.f32 1.0, %v2344_v36 }
 0xe84   :  { %v1330_v57 = vmul.f32 0.5, %v1327_v52 }
 0xe85   :  { %v2346_v58 = vpop.eup %2345 }
 0xe86   :  { %v1333_v2 = vsel %vm471_vm6, %v2344_v36, %v1330_v57  ;;  %v1328_v6 = vadd.f32 1.0, %v2346_v58 }
 0xe87   :  { %1342 = vrot.lane.b32.xlu0 %v1333_v2, %s2408_s16  ;;  %v1336_v55 = vmul.f32 %v1333_v2, %v2907_v49 }
 0xe88   :  { %v1331_v10 = vmul.f32 0.5, %v1328_v6 }
 0xe89   :  { %v2348_v11 = vpop.eup %2347 }
 0xe8a   :  { %v1334_v13 = vsel %vm471_vm6, %v2346_v58, %v1331_v10  ;;  %v1329_v45 = vadd.f32 1.0, %v2348_v11 }
 0xe8b   :  { %1344 = vrot.lane.b32.xlu1 %v1334_v13, %s2408_s16  ;;  %v1337_v27 = vmul.f32 %v1334_v13, %v2911_v39  ;;  %v39_v39 = vld [vmem:[%s3191_s0 + $0x90] sm:$0xff] }
 0xe8c   :  { %v1332_v15 = vmul.f32 0.5, %v1329_v45 }
 0xe8e   :  { %v1335_v16 = vsel %vm471_vm6, %v2348_v11, %v1332_v15 }
 0xe8f   :  { %1346 = vrot.lane.b32.xlu0 %v1335_v16, %s2408_s16  ;;  %v1338_v35 = vmul.f32 %v1335_v16, %v2915_v22  ;;  %v40_v22 = vld [vmem:[%s3191_s0 + $0x98] sm:$0xff] }
 0xef9   :  { %v1343_v53 = vpop.permute.xlu0 %1342 }
 0xefa   :  { %v1351_v17 = vmul.f32 %v1343_v53, %v1333_v2 }
 0xefc   :  { %1357 = vrot.lane.b32.xlu1 %v1351_v17, %s2408_s16 }
 0xefd   :  { %v1345_v18 = vpop.permute.xlu1 %1344 }
 0xefe   :  { %v1352_v20 = vmul.f32 %v1345_v18, %v1334_v13 }
 0xf00   :  { %1359 = vrot.lane.b32.xlu0 %v1352_v20, %s2408_s16 }
 0xf01   :  { %v1347_v51 = vpop.permute.xlu0 %1346 }
 0xf02   :  { %v1353_v25 = vmul.f32 %v1347_v51, %v1335_v16 }
 0xf04   :  { %1361 = vrot.lane.b32.xlu1 %v1353_v25, %s2408_s16 }
 0xf6e   :  { %v1358_v26 = vpop.permute.xlu1 %1357 }
 0xf6f   :  { %v2994_v21 = vadd.f32 %v1358_v26, %v1336_v55 }
 0xf71   :  { %2349 = vtanh.f32 %v2994_v21 }
 0xf72   :  { %v1360_v30 = vpop.permute.xlu0 %1359 }
 0xf73   :  { %v2998_v34 = vadd.f32 %v1360_v30, %v1337_v27 }
 0xf75   :  { %2351 = vtanh.f32 %v2998_v34 }
 0xf76   :  { %v1362_v37 = vpop.permute.xlu1 %1361 }
 0xf77   :  { %v3002_v4 = vadd.f32 %v1362_v37, %v1338_v35 }
 0xf79   :  { %2353 = vtanh.f32 %v3002_v4 }
 0xf7e   :  { %v2350_v49 = vpop.eup %2349 }
 0xf7f   :  { %1375 = vrot.lane.b32.xlu0 %v2350_v49, %s2408_s16 }
 0xf82   :  { %v2352_v44 = vpop.eup %2351 }
 0xf83   :  { %1377 = vrot.lane.b32.xlu1 %v2352_v44, %s2408_s16 }
 0xf86   :  { %v2354_v59 = vpop.eup %2353 }
 0xf87   :  { %1379 = vrot.lane.b32.xlu0 %v2354_v59, %s2408_s16  ;;  %102 = vperm.xlu1 %2282, %v39_v39  }
 0xf8b   :  { %105 = vperm.xlu0 %2281, %v40_v22   ;;  %108 = vperm.xlu1 %2282, %v41_v0  }
 0xf8f   :  { %111 = vperm.xlu0 %2281, %v42_v54   ;;  %114 = vperm.xlu1 %2282, %v43_v8  }
 0xf93   :  { %117 = vperm.xlu0 %2281, %v44_v12  }
 0xff1   :  { %v1376_v9 = vpop.permute.xlu0 %1375 }
 0xff2   :  { %v3026_v60 = vmul.f32 %v1376_v9, %v1333_v2 }
 0xff4   :  { %v1387_v40 = vmax.f32 %v2930_v29, %v3026_v60  ;;  %v3032_v62 = vadd.f32 %v3026_v60, %v2933_v32  ;;  %1394 = vrot.lane.b32.xlu1 %v3026_v60, %s2409_s17 }
 0xff5   :  { %v1378_v41 = vpop.permute.xlu1 %1377 }
 0xff6   :  { %v1385_v42 = vmul.f32 %v1378_v41, %v1334_v13 }
 0xff8   :  { %v3037_v43 = vadd.f32 %v1385_v42, %v2937_v50  ;;  %1396 = vrot.lane.b32.xlu0 %v1385_v42, %s2409_s17 }
 0xff9   :  { %v1380_v63 = vpop.permute.xlu0 %1379 }
 0xffa   :  { %v1386_v46 = vmul.f32 %v1380_v63, %v1335_v16 }
 0xffc   :  { %v3041_v47 = vadd.f32 %v1386_v46, %v2941_v38  ;;  %1398 = vrot.lane.b32.xlu1 %v1386_v46, %s2409_s17 }
0x1002   :  { %v103_v48 = vpop.permute.xlu1 %102 }
0x1003   :  { %vm137_vm11 = vcmp.eq.s32.totalorder %v103_v48, %v2477_v14 }
0x1004   :  { %v1950_v32 = vsel %vm137_vm11, 1.0, %v2407_v7 }
0x1005   :  { %2133 = vmatprep.mubr.msk.f32.mxu0 %vm205_vm1, %v1950_v32 }
0x1006   :  { %v109_v3 = vpop.permute.xlu1 %108  ;;  %v106_v19 = vpop.permute.xlu0 %105 }
0x1007   :  { %vm139_vm12 = vcmp.eq.s32.totalorder %v109_v3, %v2477_v14  ;;  %vm138_vm13 = vcmp.eq.s32.totalorder %v106_v19, %v2477_v14 }
0x1008   :  { %v1952_v50 = vsel %vm139_vm12, 1.0, %v2407_v7  ;;  %v1951_v38 = vsel %vm138_vm13, 1.0, %v2407_v7 }
0x1009   :  { %2134 = vmatmul.mubr.msk.f32.gmra.mxu0 %vm205_vm1, %v1951_v38 }
0x100a   :  { %v115_v56 = vpop.permute.xlu1 %114  ;;  %2136 = vmatprep.mubr.msk.f32.mxu0 %vm205_vm1, %v1952_v50  ;;  %v112_v1 = vpop.permute.xlu0 %111 }
0x100b   :  { %vm141_vm14 = vcmp.eq.s32.totalorder %v115_v56, %v2477_v14  ;;  %vm140_vm15 = vcmp.eq.s32.totalorder %v112_v1, %v2477_v14 }
0x100c   :  { %v1954_v31 = vsel %vm141_vm14, 1.0, %v2407_v7  ;;  %v1953_v28 = vsel %vm140_vm15, 1.0, %v2407_v7 }
0x100d   :  { %2137 = vmatmul.mubr.msk.f32.gmra.mxu0 %vm205_vm1, %v1953_v28 }
0x100e   :  { %2139 = vmatprep.mubr.msk.f32.mxu0 %vm205_vm1, %v1954_v31  ;;  %v118_v23 = vpop.permute.xlu0 %117 }
0x100f   :  { %vm142_vm0 = vcmp.eq.s32.totalorder %v118_v23, %v2477_v14 }
0x1010   :  { %v1955_v5 = vsel %vm142_vm0, 1.0, %v2407_v7 }
0x1011   :  { %2140 = vmatmul.mubr.msk.f32.gmra.mxu0 %vm205_vm1, %v1955_v5  ;;  %vm1746_vm1 = vcmask 195584  }
0x1012   :  { %2235 = vmatprep.mubr.msk.f32.mxu0 %vm2410_vm7, %v2407_v7 }
0x1066   :  { %v1395_v33 = vpop.permute.xlu1 %1394 }
0x1067   :  { %2236 = vmatmul.mubr.msk.f32.vlgmr.msra.gmra.mxu0 %vm532_vm10, %v1395_v33 }
0x1068   :  { %2238 = vmatprep.mubr.msk.f32.mxu0 %vm2410_vm7, %v2407_v7 }
0x106a   :  { %v1397_v24 = vpop.permute.xlu0 %1396 }
0x106b   :  { %2239 = vmatmul.mubr.msk.f32.gmra.mxu0 %vm532_vm10, %v1397_v24 }
0x106c   :  { %2241 = vmatprep.mubr.msk.f32.mxu0 %vm2410_vm7, %v2407_v7 }
0x106e   :  { %v1399_v36 = vpop.permute.xlu1 %1398 }
0x106f   :  { %2242 = vmatmul.mubr.msk.f32.gmra.mxu0 %vm532_vm10, %v1399_v36 }
0x1070   :  { %2267 = vmatprep.mubr.msk.f32.mxu0 %vm2410_vm7, %v2407_v7 }
0x10c9   :  { %v2135_v52 = vpop.f32.mrf.mxu0 }
0x10ca   :  { %v444_v16 = vadd.f32 %v2969_v61, %v2135_v52 }
0x10cb   :  { %v438_v57 = vpop.f32.mrf.mxu0 }
0x10cc   :  { %v439_v11 = vadd.f32 %v2969_v61, %v438_v57 }
0x10cd   :  { %v3073_v58 = vpop.f32.mrf.mxu0 }
0x10cf   :  { %v448_v2 = vpop.f32.mrf.mxu0 }
0x10d0   :  { %v449_v25 = vadd.f32 %v2969_v61, %v448_v2 }
0x10d1   :  { %v3075_v6 = vpop.f32.mrf.mxu0 }
0x10d3   :  { %v3077_v10 = vpop.f32.mrf.mxu0 }
0x1127   :  { %v1472_v13 = vpop.f32.mrf.mxu0 }
0x1128   :  { %v1486_v45 = vadd.f32 %v1472_v13, %v439_v11 }
0x1129   :  { %v2237_v15 = vpop.f32.mrf.mxu0 }
0x112a   :  { %v1489_v53 = vmul.f32 0.5, %v1486_v45 }
0x112b   :  { %v1477_v17 = vpop.f32.mrf.mxu0 }
0x112c   :  { %v1492_v18 = vsel %vm471_vm6, %v1486_v45, %v1489_v53  ;;  %v1487_v20 = vadd.f32 %v1477_v17, %v444_v16 }
0x112d   :  { %2355 = vtanh.f32 %v1492_v18  ;;  %v2240_v51 = vpop.f32.mrf.mxu0  ;;  %v459_v18 = vadd.f32 %v2969_v61, %v3077_v10 }
0x112e   :  { %v1490_v55 = vmul.f32 0.5, %v1487_v20 }
0x112f   :  { %v1482_v26 = vpop.f32.mrf.mxu0 }
0x1130   :  { %v1493_v27 = vsel %vm471_vm6, %v1487_v20, %v1490_v55  ;;  %v1488_v30 = vadd.f32 %v1482_v26, %v449_v25  ;;  %v464_v26 = vadd.f32 %v2969_v61, %v3075_v6 }
0x1131   :  { %2357 = vtanh.f32 %v1493_v27  ;;  %v2243_v35 = vpop.f32.mrf.mxu0 }
0x1132   :  { %v1491_v37 = vmul.f32 0.5, %v1488_v30 }
0x1134   :  { %v1494_v49 = vsel %vm471_vm6, %v1488_v30, %v1491_v37 }
0x1135   :  { %2359 = vtanh.f32 %v1494_v49 }
0x113a   :  { %v2356_v44 = vpop.eup %2355 }
0x113b   :  { %v1498_v39 = vadd.f32 1.0, %v2356_v44 }
0x113d   :  { %v1501_v59 = vmul.f32 0.5, %v1498_v39 }
0x113e   :  { %v2358_v22 = vpop.eup %2357 }
0x113f   :  { %v1504_v0 = vsel %vm471_vm6, %v2356_v44, %v1501_v59  ;;  %v1499_v54 = vadd.f32 1.0, %v2358_v22 }
0x1140   :  { %1513 = vrot.lane.b32.xlu0 %v1504_v0, %s2408_s16  ;;  %v1507_v38 = vmul.f32 %v1504_v0, %v2994_v21 }
0x1141   :  { %v1502_v8 = vmul.f32 0.5, %v1499_v54 }
0x1142   :  { %v2360_v12 = vpop.eup %2359 }
0x1143   :  { %v1505_v9 = vsel %vm471_vm6, %v2358_v22, %v1502_v8  ;;  %v1500_v41 = vadd.f32 1.0, %v2360_v12 }
0x1144   :  { %1515 = vrot.lane.b32.xlu1 %v1505_v9, %s2408_s16  ;;  %v1508_v31 = vmul.f32 %v1505_v9, %v2998_v34 }
0x1145   :  { %v1503_v42 = vmul.f32 0.5, %v1500_v41 }
0x1147   :  { %v1506_v63 = vsel %vm471_vm6, %v2360_v12, %v1503_v42 }
0x1148   :  { %1517 = vrot.lane.b32.xlu0 %v1506_v63, %s2408_s16  ;;  %v1509_v5 = vmul.f32 %v1506_v63, %v3002_v4 }
0x11b2   :  { %v1514_v46 = vpop.permute.xlu0 %1513 }
0x11b3   :  { %v1522_v48 = vmul.f32 %v1514_v46, %v1504_v0 }
0x11b5   :  { %1528 = vrot.lane.b32.xlu1 %v1522_v48, %s2408_s16 }
0x11b6   :  { %v1516_v32 = vpop.permute.xlu1 %1515 }
0x11b7   :  { %v1523_v3 = vmul.f32 %v1516_v32, %v1505_v9 }
0x11b9   :  { %1530 = vrot.lane.b32.xlu0 %v1523_v3, %s2408_s16 }
0x11ba   :  { %v1518_v19 = vpop.permute.xlu0 %1517 }
0x11bb   :  { %v1524_v50 = vmul.f32 %v1518_v19, %v1506_v63 }
0x11bd   :  { %1532 = vrot.lane.b32.xlu1 %v1524_v50, %s2408_s16 }
0x1227   :  { %v1529_v56 = vpop.permute.xlu1 %1528 }
0x1228   :  { %v3101_v1 = vadd.f32 %v1529_v56, %v1507_v38 }
0x122a   :  { %2361 = vtanh.f32 %v3101_v1 }
0x122b   :  { %v1531_v28 = vpop.permute.xlu0 %1530 }
0x122c   :  { %v3105_v23 = vadd.f32 %v1531_v28, %v1508_v31 }
0x122e   :  { %2363 = vtanh.f32 %v3105_v23 }
0x122f   :  { %v1533_v33 = vpop.permute.xlu1 %1532 }
0x1230   :  { %v3109_v24 = vadd.f32 %v1533_v33, %v1509_v5 }
0x1232   :  { %2365 = vtanh.f32 %v3109_v24 }
0x1237   :  { %v2362_v21 = vpop.eup %2361 }
0x1238   :  { %1546 = vrot.lane.b32.xlu0 %v2362_v21, %s2408_s16 }
0x123b   :  { %v2364_v36 = vpop.eup %2363 }
0x123c   :  { %1548 = vrot.lane.b32.xlu1 %v2364_v36, %s2408_s16 }
0x123f   :  { %v2366_v52 = vpop.eup %2365 }
0x1240   :  { %1550 = vrot.lane.b32.xlu0 %v2366_v52, %s2408_s16 }
0x12aa   :  { %v1547_v34 = vpop.permute.xlu0 %1546 }
0x12ab   :  { %v1555_v57 = vmul.f32 %v1547_v34, %v1504_v0 }
0x12ad   :  { %1565 = vrot.lane.b32.xlu1 %v1555_v57, %s2409_s17  ;;  %v3119_v4 = vmax.f32 %v1387_v40, %v1555_v57  ;;  %v3122_v2 = vadd.f32 %v1555_v57, %v3032_v62  ;;  %v454_v62 = vadd.f32 %v2969_v61, %v3073_v58 }
0x12ae   :  { %v1549_v11 = vpop.permute.xlu1 %1548 }
0x12af   :  { %v1556_v13 = vmul.f32 %v1549_v11, %v1505_v9 }
0x12b1   :  { %v3125_v45 = vadd.f32 %v1556_v13, %v3037_v43  ;;  %1567 = vrot.lane.b32.xlu0 %v1556_v13, %s2409_s17 }
0x12b2   :  { %v1551_v15 = vpop.permute.xlu0 %1550 }
0x12b3   :  { %v1557_v16 = vmul.f32 %v1551_v15, %v1506_v63 }
0x12b5   :  { %v3129_v53 = vadd.f32 %v1557_v16, %v3041_v47  ;;  %1569 = vrot.lane.b32.xlu1 %v1557_v16, %s2409_s17 }
0x131f   :  { %v1566_v29 = vpop.permute.xlu1 %1565 }
0x1320   :  { %2253 = vmatmul.mubr.msk.f32.vlgmr.msra.gmra.mxu1 %vm532_vm10, %v1566_v29 }
0x1321   :  { %2255 = vmatprep.mubr.msk.f32.mxu1 %vm2410_vm7, %v2407_v7 }
0x1323   :  { %v1568_v60 = vpop.permute.xlu0 %1567 }
0x1324   :  { %2256 = vmatmul.mubr.msk.f32.gmra.mxu1 %vm532_vm10, %v1568_v60 }
0x1325   :  { %2258 = vmatprep.mubr.msk.f32.mxu1 %vm2410_vm7, %v2407_v7 }
0x1327   :  { %v1570_v40 = vpop.permute.xlu1 %1569 }
0x1328   :  { %2259 = vmatmul.mubr.msk.f32.gmra.mxu1 %vm532_vm10, %v1570_v40 }
0x13e0   :  { %v1643_v43 = vpop.f32.mrf.mxu1 }
0x13e1   :  { %v1657_v47 = vadd.f32 %v1643_v43, %v454_v62 }
0x13e2   :  { %v2254_v17 = vpop.f32.mrf.mxu1 }
0x13e3   :  { %v1660_v51 = vmul.f32 0.5, %v1657_v47 }
0x13e4   :  { %v1648_v20 = vpop.f32.mrf.mxu1 }
0x13e5   :  { %v1658_v25 = vadd.f32 %v1648_v20, %v459_v18  ;;  %v1663_v35 = vsel %vm471_vm6, %v1657_v47, %v1660_v51 }
0x13e6   :  { %v2257_v55 = vpop.f32.mrf.mxu1 }
0x13e7   :  { %v1661_v27 = vmul.f32 0.5, %v1658_v25 }
0x13e8   :  { %v1653_v30 = vpop.f32.mrf.mxu1 }
0x13e9   :  { %v1664_v58 = vsel %vm471_vm6, %v1658_v25, %v1661_v27  ;;  %v1659_v37 = vadd.f32 %v1653_v30, %v464_v26 }
0x13ea   :  { %2367 = vtanh.f32 %v1664_v58  ;;  %v2260_v49 = vpop.f32.mrf.mxu1 }
0x13eb   :  { %v1662_v44 = vmul.f32 0.5, %v1659_v37  ;;  %2369 = vtanh.f32 %v1663_v35 }
0x13ed   :  { %v1665_v10 = vsel %vm471_vm6, %v1659_v37, %v1662_v44 }
0x13ee   :  { %2371 = vtanh.f32 %v1665_v10 }
0x13f7   :  { %v2368_v39 = vpop.eup %2367 }
0x13f8   :  { %v1670_v59 = vadd.f32 1.0, %v2368_v39  ;;  %v2370_v61 = vpop.eup %2369 }
0x13f9   :  { %v1669_v8 = vadd.f32 1.0, %v2370_v61 }
0x13fa   :  { %v1673_v6 = vmul.f32 0.5, %v1670_v59 }
0x13fb   :  { %v2372_v22 = vpop.eup %2371  ;;  %v1672_v41 = vmul.f32 0.5, %v1669_v8 }
0x13fc   :  { %v1676_v0 = vsel %vm471_vm6, %v2368_v39, %v1673_v6  ;;  %v1671_v54 = vadd.f32 1.0, %v2372_v22 }
0x13fd   :  { %1686 = vrot.lane.b32.xlu1 %v1676_v0, %s2408_s16  ;;  %v1675_v42 = vsel %vm471_vm6, %v2370_v61, %v1672_v41  ;;  %v1679_v50 = vmul.f32 %v1676_v0, %v3105_v23 }
0x13fe   :  { %v1674_v12 = vmul.f32 0.5, %v1671_v54  ;;  %v1678_v5 = vmul.f32 %v1675_v42, %v3101_v1 }
0x1400   :  { %v1677_v9 = vsel %vm471_vm6, %v2372_v22, %v1674_v12  ;;  %vm1825_vm6 = vcmask 257024  }
0x1401   :  { %1688 = vrot.lane.b32.xlu0 %v1677_v9, %s2408_s16  ;;  %v1680_v14 = vmul.f32 %v1677_v9, %v3109_v24 }
0x1405   :  { %1684 = vrot.lane.b32.xlu0 %v1675_v42, %s2408_s16 }
0x146f   :  { %v1687_v63 = vpop.permute.xlu1 %1686 }
0x1470   :  { %v1694_v46 = vmul.f32 %v1687_v63, %v1676_v0 }
0x1472   :  { %1701 = vrot.lane.b32.xlu0 %v1694_v46, %s2408_s16 }
0x1473   :  { %v1689_v48 = vpop.permute.xlu0 %1688 }
0x1474   :  { %v1695_v32 = vmul.f32 %v1689_v48, %v1677_v9 }
0x1476   :  { %1703 = vrot.lane.b32.xlu1 %v1695_v32, %s2408_s16 }
0x1477   :  { %v1685_v3 = vpop.permute.xlu0 %1684 }
0x1478   :  { %v1693_v19 = vmul.f32 %v1685_v3, %v1675_v42 }
0x147a   :  { %1699 = vrot.lane.b32.xlu1 %v1693_v19, %s2408_s16 }
0x14e4   :  { %v1702_v38 = vpop.permute.xlu0 %1701 }
0x14e5   :  { %v1709_v56 = vadd.f32 %v1702_v38, %v1679_v50 }
0x14e7   :  { %2373 = vtanh.f32 %v1709_v56 }
0x14e8   :  { %v1704_v31 = vpop.permute.xlu1 %1703 }
0x14e9   :  { %v1710_v28 = vadd.f32 %v1704_v31, %v1680_v14 }
0x14eb   :  { %2375 = vtanh.f32 %v1710_v28 }
0x14ec   :  { %v1700_v33 = vpop.permute.xlu1 %1699 }
0x14ed   :  { %v1708_v21 = vadd.f32 %v1700_v33, %v1678_v5 }
0x14ef   :  { %2377 = vtanh.f32 %v1708_v21 }
0x14f4   :  { %v2374_v36 = vpop.eup %2373 }
0x14f5   :  { %1719 = vrot.lane.b32.xlu1 %v2374_v36, %s2408_s16 }
0x14f8   :  { %v2376_v52 = vpop.eup %2375 }
0x14f9   :  { %1721 = vrot.lane.b32.xlu0 %v2376_v52, %s2408_s16 }
0x14fc   :  { %v2378_v23 = vpop.eup %2377 }
0x14fd   :  { %1717 = vrot.lane.b32.xlu0 %v2378_v23, %s2408_s16 }
0x1567   :  { %v1720_v34 = vpop.permute.xlu1 %1719 }
0x1568   :  { %v1727_v57 = vmul.f32 %v1720_v34, %v1676_v0 }
0x156a   :  { %v1731_v24 = vadd.f32 %v1727_v57, %v3125_v45 }
0x156b   :  { %v1722_v11 = vpop.permute.xlu0 %1721 }
0x156c   :  { %v1728_v13 = vmul.f32 %v1722_v11, %v1677_v9  ;;  %1739 = vrot.lane.b32.xlu0 %v1731_v24, %s2409_s17 }
0x156e   :  { %v1732_v1 = vadd.f32 %v1728_v13, %v3129_v53  ;;  %v1733_v53 = vld [vmem:[%s3195_s4] sm:$0x1f]  ;;  %s2411_s4 = smov [#allocation2]  }
0x156f   :  { %v1718_v15 = vpop.permute.xlu0 %1717  ;;  %s1924_s15 = sshll.u32 %s2411_s4, 4  ;;  %s1925_s15 = int_to_ptr.vmem [resolvable:$true] %s1924_s15 }
0x1570   :  { %v1726_v16 = vmul.f32 %v1718_v15, %v1675_v42  ;;  %1741 = vrot.lane.b32.xlu1 %v1732_v1, %s2409_s17  ;;  %s2384_s18 = scalar_lea.vmem %s1925_s15, 64  ;;  %p2389_p1 = scmp.lt.s32.totalorder %s1925_s15, %s1925_s15 }
0x1571   :  { %p2385_p0 = scmp.ne.s32.totalorder %s1925_s15, %s2384_s18  ;;  %p2390_p2 = scmp.lt.s32.totalorder %s2384_s18, %s2384_s18 }
0x1572   :  { %v1729_v29 = vmax.f32 %v3119_v4, %v1726_v16  ;;  %v1730_v60 = vadd.f32 %v1726_v16, %v3122_v2 }
0x1573   :  { %p2391_p3 = por %p2390_p2, %p2389_p1 }
0x1574   :  { %v1820_v40 = vmul.f32 %v1729_v29, %v1729_v29  ;;  %1737 = vrot.lane.b32.xlu1 %v1730_v60, %s2409_s17 }
0x1575   :  { %p2392_p4 = pnand %p2391_p3, %p2385_p0 }
0x1576   :  { %1822 = vrot.lane.b32.xlu0 %v1820_v40, %s2409_s17 }
0x15de   :  { %v1740_v62 = vpop.permute.xlu0 %1739 }
0x15e2   :  { %v1742_v45 = vpop.permute.xlu1 %1741 }
0x15e3   :  { %2262 = vmatpush3.msra.mxu0 %v1742_v45 }
0x15e4   :  { %2263 = vmatprep.subr.mxu0 %v2407_v7 }
0x15e5   :  { %2264 = vmatpush3.msra.mxu0 %v1740_v62 }
0x15e6   :  { %v1738_v43 = vpop.permute.xlu1 %1737  ;;  %2265 = vmatprep.subr.mxu0 %v2407_v7 }
0x15e7   :  { %2266 = vmatpush3.msra.mxu0 %v1738_v43 }
0x15e8   :  { %2268 = vmatmul.mubr.msk.f32.vlgmr.msra.gmra.mxu0 %vm1746_vm1, %v1733_v53  ;;  %v1823_v4 = vpop.permute.xlu0 %1822  ;;  %2270 = vmatprep.subr.mxu0 %v2407_v7 }
0x15e9   :  { %v1826_v2 = vsel %vm1825_vm6, %v1823_v4, 0.0  ;;  %2272 = vmatprep.mubr.msk.f32.mxu0 %vm2410_vm7, %v2407_v7  ;;  %vm1916_vm7 = vcmask 35840  }
0x15ea   :  { %1827 = vadd.xlane.f32.xlu1 %v1826_v2 }
0x1673   :  { %v1828_v51 = vpop.xlane.xlu1 %1827 }
0x1674   :  { %2379 = vrsqrt.f32 %v1828_v51 }
0x1681   :  { %v2380_v25 = vpop.eup %2379 }
0x1682   :  { %v1835_v55 = vmul.f32 %v2380_v25, %v1729_v29 }
0x16a8   :  { %v1816_v47 = vpop.f32.mrf.mxu0 }
0x16a9   :  { %v1829_v17 = vmul.f32 %v1816_v47, %v1816_v47 }
0x16aa   :  { %v2269_v18 = vpop.f32.mrf.mxu0 }
0x16ab   :  { %v1831_v20 = vsel %vm1830_vm2, %v1829_v17, 0.0 }
0x16ac   :  { %1832 = vadd.xlane.f32.xlu0 %v1831_v20 }
0x16c2   :  { %1839 = vrot.lane.b32.xlu0 %v1835_v55, %s2409_s17 }
0x1735   :  { %v1833_v26 = vpop.xlane.xlu0 %1832 }
0x1736   :  { %2381 = vrsqrt.f32 %v1833_v26 }
0x1739   :  { %v1840_v7 = vpop.permute.xlu0 %1839 }
0x1743   :  { %v2382_v27 = vpop.eup %2381 }
0x1744   :  { %v1837_v30 = vmul.f32 %v2382_v27, %v1816_v47 }
0x1746   :  { %2271 = vmatpush3.xpose.msk.msra.mxu0 %vm532_vm10, %v1837_v30 }
0x1749   :  { %2273 = vmatmul.mubr.msk.f32.vlgmr.msra.gmra.mxu0 %vm532_vm10, %v1840_v7 }
0x1809   :  { %v1912_v35 = vpop.f32.mrf.mxu0 }
0x180a   :  { %1917 = vst.msk [vmem:[#allocation2] sm:$0xf] %vm1916_vm7, %v1912_v35 }
0x180b   :  { %v2274_v58 = vpop.f32.mrf.mxu0 }
0x180c   :  { %2395 = shalt.err (!%p2392_p4)
}
0x180d   :  { %1927 = dma.vmem_to_hbm [thread:$0]  %s1925_s15, 64, %s3196_s5, [#allocation3]  }
0x180e   :  { %2404 = dma.done.wait [#allocation3], 64  }
0x180f   :  { %2405 = vsyncadd [#allocation3], 4294967232 }
0x1810   :  { %1931 = vsyncpa [#allocation3], 1 }

</bundles_post_ra>
